<compile_context>
chip_gen: v7x
topology: tpu7x:2x2x1
jax: 0.10.0
libtpu: 0.0.40
codegen_flags: <defaults>
</compile_context>

<pallas_src>
import math
import functools

import jax
import jax.numpy as jnp
from jax.experimental import pallas as pl
from jax.experimental.pallas import tpu as pltpu


# --------------------------------------------------------------------------
# Compiler-param helpers
# --------------------------------------------------------------------------
@functools.lru_cache(maxsize=None)
def _vmem_limit_bytes():
    cap = 64 * 1024 * 1024  # conservative fallback (v7x physical VMEM)
    try:
        info_cap = int(pltpu.get_tpu_info().vmem_capacity_bytes)
        if info_cap > 0:
            cap = info_cap
    except Exception:
        pass
    # ~96 MiB on v5e/v6e (128 MiB physical), ~48 MiB on v7x (64 MiB physical)
    return min((cap * 3) // 4, 100 * 1024 * 1024)


def _compiler_params(sem):
    return pltpu.CompilerParams(
        dimension_semantics=sem, vmem_limit_bytes=_vmem_limit_bytes())


def _pick_heads_per_block(num_heads, head_dim, min_width=256):
    # Smallest divisor of num_heads whose combined width is a 128-multiple and
    # >= min_width (good MXU N utilization + lane-dense stores).  Fall back to
    # all heads (block width == H == full extent, always a legal BlockSpec).
    # Note: on v5e (128x128 MXUs) min_width=128 is already sufficient.
    for cand in range(1, num_heads + 1):
        if num_heads % cand:
            continue
        n = cand * head_dim
        if n % 128 == 0 and n >= min_width:
            return cand
    return num_heads


def _pick_seq_tile(S, target=512):
    if S <= target:
        return S
    t = (target // 8) * 8
    while t >= 8:
        if S % t == 0:
            return t
        t -= 8
    return S  # full extent is always a legal block


# --------------------------------------------------------------------------
# Kernel 1: fused self-attention + output projection + residual + LayerNorm
#   grid = (B, n_head_groups)   — head-group axis is an "arbitrary" reduction
# --------------------------------------------------------------------------
def _attn_output_kernel(scale, heads_per_blk, head_dim, eps,
                        x_ref, wqkv_ref, bqkv_ref, mask_ref,
                        wo_ref, bo_ref, g_ref, beta_ref,
                        o_ref, acc_ref):
    # x_ref    : (1, S, H)      one batch row of hidden_states
    # wqkv_ref : (H, 3*g*d)     interleaved [Wq|Wk|Wv] columns of head group j
    # bqkv_ref : (1, 3*g*d)     matching bias slice
    # mask_ref : (1, 1, S)      additive attention mask for this batch row
    # wo_ref   : (g*d, H)       rows of the output projection for group j
    # bo/g/beta: (1, H)
    # o_ref    : (1, S, H)      final attention-block output (post-LayerNorm)
    # acc_ref  : (S, H) f32     VMEM accumulator for the output projection
    j = pl.program_id(1)

    @pl.when(j == 0)
    def _init():
        acc_ref[...] = jnp.zeros_like(acc_ref)

    cdt = wqkv_ref.dtype                             # MXU-native operand dtype
    x = x_ref[0].astype(cdt)                         # (S, H)
    gd = heads_per_blk * head_dim

    qkv = jnp.dot(x, wqkv_ref[...], preferred_element_type=jnp.float32)
    qkv = qkv + bqkv_ref[...].astype(jnp.float32)    # (S, 3*gd), f32
    mask = mask_ref[0].astype(jnp.float32)           # (1, S), additive

    ctx_parts = []
    for h in range(heads_per_blk):                   # static, unrolled
        lo, hi = h * head_dim, (h + 1) * head_dim
        q_h = qkv[:, lo:hi].astype(cdt)
        k_h = qkv[:, gd + lo:gd + hi].astype(cdt)
        v_h = qkv[:, 2 * gd + lo:2 * gd + hi].astype(cdt)
        # QK^T via dimension numbers (no materialized transpose), f32 accumulate.
        s = jax.lax.dot_general(q_h, k_h, (((1,), (1,)), ((), ())),
                                preferred_element_type=jnp.float32)
        s = s * scale + mask
        s = s - jnp.max(s, axis=-1, keepdims=True)
        e = jnp.exp(s)
        denom = jnp.sum(e, axis=-1, keepdims=True)
        inv = pl.reciprocal(denom, approx=True)
        inv = inv * (2.0 - denom * inv)              # one Newton step -> exact
        p = (e * inv).astype(cdt)
        # TODO(synk): attention_probs dropout is identity in eval mode; head_mask
        # not supported (None in the encoder-only path).
        ctx_parts.append(jnp.dot(p, v_h, preferred_element_type=jnp.float32))

    ctx = ctx_parts[0] if heads_per_blk == 1 else jnp.concatenate(ctx_parts, -1)
    # Accumulate this head-group's contribution to the output projection.
    acc_ref[...] += jnp.dot(ctx.astype(cdt), wo_ref[...],
                            preferred_element_type=jnp.float32)

    @pl.when(j == pl.num_programs(1) - 1)
    def _finalize():
        # TODO(synk): hidden_dropout is identity in eval mode.
        y = acc_ref[...] + bo_ref[...].astype(jnp.float32) \
            + x_ref[0].astype(jnp.float32)
        mu = jnp.mean(y, axis=-1, keepdims=True)
        yc = y - mu
        var = jnp.mean(yc * yc, axis=-1, keepdims=True)
        y = yc * jax.lax.rsqrt(var + eps)
        y = y * g_ref[...].astype(jnp.float32) + beta_ref[...].astype(jnp.float32)
        o_ref[0] = y.astype(o_ref.dtype)             # single lane-dense store


def attention_block(hidden_states, mask_b1s, wqkv, bqkv, wo, bo, ln_g, ln_b,
                    num_heads, heads_per_blk, eps):
    """hidden_states: (B,S,H); wqkv: (H, n_blk*3*g*d) interleaved; wo: (H,H)
    stored (in,out); biases (1,N); mask_b1s: (B,1,S) additive."""
    B, S, H = hidden_states.shape
    d = H // num_heads
    g = heads_per_blk
    gd = g * d
    n_blk = num_heads // g
    scale = 1.0 / math.sqrt(d)

    kernel = functools.partial(_attn_output_kernel, scale, g, d, eps)
    return pl.pallas_call(
        kernel,
        out_shape=jax.ShapeDtypeStruct((B, S, H), hidden_states.dtype),
        grid=(B, n_blk),
        in_specs=[
            pl.BlockSpec((1, S, H), lambda b, j: (b, 0, 0)),     # hidden_states
            pl.BlockSpec((H, 3 * gd), lambda b, j: (0, j)),      # fused Wqkv grp
            pl.BlockSpec((1, 3 * gd), lambda b, j: (0, j)),      # fused bias grp
            pl.BlockSpec((1, 1, S), lambda b, j: (b, 0, 0)),     # additive mask
            pl.BlockSpec((gd, H), lambda b, j: (j, 0)),          # Wo row group
            pl.BlockSpec((1, H), lambda b, j: (0, 0)),           # bo
            pl.BlockSpec((1, H), lambda b, j: (0, 0)),           # LN gamma
            pl.BlockSpec((1, H), lambda b, j: (0, 0)),           # LN beta
        ],
        out_specs=pl.BlockSpec((1, S, H), lambda b, j: (b, 0, 0)),
        scratch_shapes=[pltpu.VMEM((S, H), jnp.float32)],
        compiler_params=_compiler_params(("parallel", "arbitrary")),
    )(hidden_states, wqkv, bqkv, mask_b1s, wo, bo, ln_g, ln_b)


# --------------------------------------------------------------------------
# Kernel 2: Intermediate + Output (dense -> GELU -> dense + residual + LN),
#   sequence-tiled: grid = (B, S // tS)
# --------------------------------------------------------------------------
def _ffn_kernel(eps, x_ref, w1_ref, b1_ref, w2_ref, b2_ref, g_ref, beta_ref,
                o_ref):
    cdt = w1_ref.dtype
    x = x_ref[0]                                                 # (tS, H)
    h = jnp.dot(x.astype(cdt), w1_ref[...], preferred_element_type=jnp.float32)
    h = h + b1_ref[...].astype(jnp.float32)
    # TODO(synk): torch default GELU is exact (erf); tanh approximation used here.
    h = jax.nn.gelu(h, approximate=True)
    y = jnp.dot(h.astype(cdt), w2_ref[...], preferred_element_type=jnp.float32)
    y = y + b2_ref[...].astype(jnp.float32)
    # TODO(synk): hidden_dropout is identity in eval mode.
    y = y + x.astype(jnp.float32)
    mu = jnp.mean(y, axis=-1, keepdims=True)
    yc = y - mu
    var = jnp.mean(yc * yc, axis=-1, keepdims=True)
    y = yc * jax.lax.rsqrt(var + eps)
    y = y * g_ref[...].astype(jnp.float32) + beta_ref[...].astype(jnp.float32)
    o_ref[0] = y.astype(o_ref.dtype)


def ffn_layernorm(x, w1, b1, w2, b2, gamma, beta, eps):
    B, S, H = x.shape
    I = w1.shape[1]
    tS = _pick_seq_tile(S)
    kernel = functools.partial(_ffn_kernel, eps)
    return pl.pallas_call(
        kernel,
        out_shape=jax.ShapeDtypeStruct((B, S, H), x.dtype),
        grid=(B, S // tS),
        in_specs=[
            pl.BlockSpec((1, tS, H), lambda b, s: (b, s, 0)),
            pl.BlockSpec((H, I), lambda b, s: (0, 0)),
            pl.BlockSpec((1, I), lambda b, s: (0, 0)),
            pl.BlockSpec((I, H), lambda b, s: (0, 0)),
            pl.BlockSpec((1, H), lambda b, s: (0, 0)),
            pl.BlockSpec((1, H), lambda b, s: (0, 0)),
            pl.BlockSpec((1, H), lambda b, s: (0, 0)),
        ],
        out_specs=pl.BlockSpec((1, tS, H), lambda b, s: (b, s, 0)),
        compiler_params=_compiler_params(("parallel", "parallel")),
    )(x, w1, b1, w2, b2, gamma, beta)


# --------------------------------------------------------------------------
# Encoder: stack of BertGenerationLayer (self-attention block + FFN block)
# --------------------------------------------------------------------------
def bert_encoder_forward(hidden_states, attention_mask, layer_params,
                         num_heads, eps=1e-12):
    """attention_mask: (B, S) additive (0 = keep, -1e4 = masked)."""
    B, S, H = hidden_states.shape
    d = H // num_heads
    g = _pick_heads_per_block(num_heads, d)
    mask_b1s = attention_mask.reshape(B, 1, S).astype(jnp.float32)
    x = hidden_states
    for p in layer_params:
        attn_out = attention_block(x, mask_b1s, p["wqkv"], p["bqkv"],
                                   p["wo"], p["bo"], p["ln1_g"], p["ln1_b"],
                                   num_heads, g, eps)
        x = ffn_layernorm(attn_out, p["w1"], p["b1"], p["w2"], p["b2"],
                          p["ln2_g"], p["ln2_b"], eps)
    return x


# --------------------------------------------------------------------------
# Parameter init / prep  (weights stored (in, out) == torch Linear W^T;
# biases stored 2-D (1, out); Q/K/V fused + interleaved by head group once)
# --------------------------------------------------------------------------
def init_encoder_params(key, num_layers, H, I):
    params = []
    for _ in range(num_layers):
        key, *ks = jax.random.split(key, 17)
        rnd = lambda k, shape, s: jax.random.normal(k, shape, jnp.float32) * s
        params.append(dict(
            wq=rnd(ks[0], (H, H), 0.05), bq=rnd(ks[1], (1, H), 0.01),
            wk=rnd(ks[2], (H, H), 0.05), bk=rnd(ks[3], (1, H), 0.01),
            wv=rnd(ks[4], (H, H), 0.05), bv=rnd(ks[5], (1, H), 0.01),
            wo=rnd(ks[6], (H, H), 0.05), bo=rnd(ks[7], (1, H), 0.01),
            w1=rnd(ks[8], (H, I), 0.05), b1=rnd(ks[9], (1, I), 0.01),
            w2=rnd(ks[10], (I, H), 0.05), b2=rnd(ks[11], (1, H), 0.01),
            ln1_g=1.0 + rnd(ks[12], (1, H), 0.05), ln1_b=rnd(ks[13], (1, H), 0.02),
            ln2_g=1.0 + rnd(ks[14], (1, H), 0.05), ln2_b=rnd(ks[15], (1, H), 0.02),
        ))
    return params


def prepare_layer_params(raw, num_heads, param_dtype=None):
    """Fuse Wq/Wk/Wv (+biases) into one interleaved-by-head-group matrix and
    optionally cast everything to param_dtype (e.g. bf16 for the MXU)."""
    H = raw["wq"].shape[0]
    d = H // num_heads
    g = _pick_heads_per_block(num_heads, d)
    gd = g * d
    n_blk = num_heads // g
    cast = (lambda a: a.astype(param_dtype)) if param_dtype is not None else (lambda a: a)

    def fuse(q, k, v, lead):
        parts = [t.reshape(lead, n_blk, gd) for t in (q, k, v)]
        return jnp.concatenate(parts, axis=2).reshape(lead, n_blk * 3 * gd)

    return dict(
        wqkv=cast(fuse(raw["wq"], raw["wk"], raw["wv"], H)),
        bqkv=cast(fuse(raw["bq"], raw["bk"], raw["bv"], 1)),
        wo=cast(raw["wo"]), bo=cast(raw["bo"]),
        ln1_g=cast(raw["ln1_g"]), ln1_b=cast(raw["ln1_b"]),
        w1=cast(raw["w1"]), b1=cast(raw["b1"]),
        w2=cast(raw["w2"]), b2=cast(raw["b2"]),
        ln2_g=cast(raw["ln2_g"]), ln2_b=cast(raw["ln2_b"]),
    )


# --------------------------------------------------------------------------
# Pure-JAX reference (uses the raw, unfused f32 parameters)
# --------------------------------------------------------------------------
def _reference_encoder(hidden_states, attention_mask, raw_params, num_heads,
                       eps=1e-12):
    B, S, H = hidden_states.shape
    d = H // num_heads
    x = hidden_states.astype(jnp.float32)
    mask = attention_mask.astype(jnp.float32)[:, None, None, :]

    def layernorm(y, g, b):
        mu = y.mean(-1, keepdims=True)
        var = ((y - mu) ** 2).mean(-1, keepdims=True)
        return (y - mu) / jnp.sqrt(var + eps) * g + b

    for p in raw_params:
        def heads(t):
            return t.reshape(B, S, num_heads, d).transpose(0, 2, 1, 3)
        q = heads(x @ p["wq"] + p["bq"])
        k = heads(x @ p["wk"] + p["bk"])
        v = heads(x @ p["wv"] + p["bv"])
        s = jnp.einsum("bhqd,bhkd->bhqk", q, k) / math.sqrt(d) + mask
        pr = jax.nn.softmax(s, axis=-1)
        ctx = jnp.einsum("bhqk,bhkd->bhqd", pr, v)
        ctx = ctx.transpose(0, 2, 1, 3).reshape(B, S, H)
        attn_out = layernorm(ctx @ p["wo"] + p["bo"] + x, p["ln1_g"], p["ln1_b"])
        hmid = jax.nn.gelu(attn_out @ p["w1"] + p["b1"], approximate=True)
        x = layernorm(hmid @ p["w2"] + p["b2"] + attn_out, p["ln2_g"], p["ln2_b"])
    return x.astype(hidden_states.dtype)


if __name__ == "__main__":
    B, S, H, NUM_HEADS, NUM_LAYERS = 2, 8, 32, 4, 2
    INTERMEDIATE = 4 * H

    key = jax.random.PRNGKey(0)
    k_x, k_p = jax.random.split(key)
    hidden_states = jax.random.normal(k_x, (B, S, H), dtype=jnp.float32)
    raw_params = init_encoder_params(k_p, NUM_LAYERS, H, INTERMEDIATE)

    # Additive attention mask (BERT style): 0 = keep, -1e4 = masked padding.
    attention_mask = jnp.zeros((B, S), dtype=jnp.float32)
    attention_mask = attention_mask.at[1, -2:].set(-1e4)

    fwd = jax.jit(functools.partial(bert_encoder_forward, num_heads=NUM_HEADS))
    ref = _reference_encoder(hidden_states, attention_mask, raw_params, NUM_HEADS)

    # --- f32 path (correctness) ---
    params_f32 = [prepare_layer_params(p, NUM_HEADS) for p in raw_params]
    out = jax.block_until_ready(fwd(hidden_states, attention_mask, params_f32))
    assert out.shape == (B, S, H)
    assert jnp.allclose(out, ref, atol=1e-2, rtol=1e-2), "mismatch vs reference (f32)"

    # --- bf16 weights + activations path (MXU-native dtype; sanity check) ---
    params_bf16 = [prepare_layer_params(p, NUM_HEADS, param_dtype=jnp.bfloat16)
                   for p in raw_params]
    out_bf16 = jax.block_until_ready(
        fwd(hidden_states.astype(jnp.bfloat16), attention_mask, params_bf16))
    out_bf16_f32 = out_bf16.astype(jnp.float32)
    assert out_bf16.shape == (B, S, H)
    assert bool(jnp.all(jnp.isfinite(out_bf16_f32)))
    assert float(jnp.max(jnp.abs(out_bf16_f32 - ref))) < 0.3, "bf16 path diverged"

    print("KERNEL_OK")
</pallas_src>

<mosaic_0001>
module attributes {stable_mosaic.version = 11 : i64} {
  func.func @_ffn_kernel(%arg0: i32, %arg1: i32, %arg2: memref<1x8x32xf32, #tpu.memory_space<vmem>>, %arg3: memref<32x128xf32, #tpu.memory_space<vmem>>, %arg4: memref<1x128xf32, #tpu.memory_space<vmem>>, %arg5: memref<128x32xf32, #tpu.memory_space<vmem>>, %arg6: memref<1x32xf32, #tpu.memory_space<vmem>>, %arg7: memref<1x32xf32, #tpu.memory_space<vmem>>, %arg8: memref<1x32xf32, #tpu.memory_space<vmem>>, %arg9: memref<1x8x32xf32, #tpu.memory_space<vmem>>) attributes {dimension_semantics = [#tpu.dimension_semantics<parallel>, #tpu.dimension_semantics<parallel>], iteration_bounds = array<i64: 2, 1>, scalar_prefetch = 0 : i64, scratch_operands = 0 : i64, tpu.core_type = #tpu.core_type<tc>, window_params = [{transform_indices = @transform_0, window_bounds = array<i64: 1, 8, 32>}, {pipeline_mode = #tpu.pipeline_mode<synchronous>, transform_indices = @transform_1, window_bounds = array<i64: 32, 128>}, {pipeline_mode = #tpu.pipeline_mode<synchronous>, transform_indices = @transform_2, window_bounds = array<i64: 1, 128>}, {pipeline_mode = #tpu.pipeline_mode<synchronous>, transform_indices = @transform_3, window_bounds = array<i64: 128, 32>}, {pipeline_mode = #tpu.pipeline_mode<synchronous>, transform_indices = @transform_4, window_bounds = array<i64: 1, 32>}, {pipeline_mode = #tpu.pipeline_mode<synchronous>, transform_indices = @transform_5, window_bounds = array<i64: 1, 32>}, {pipeline_mode = #tpu.pipeline_mode<synchronous>, transform_indices = @transform_6, window_bounds = array<i64: 1, 32>}, {transform_indices = @transform_7, window_bounds = array<i64: 1, 8, 32>}]} {
    %c0 = arith.constant 0 : index
    %c0_0 = arith.constant 0 : index
    %c0_1 = arith.constant 0 : index
    %0 = vector.load %arg2[%c0, %c0_0, %c0_1] : memref<1x8x32xf32, #tpu.memory_space<vmem>>, vector<1x8x32xf32>
    %1 = vector.shape_cast %0 : vector<1x8x32xf32> to vector<8x32xf32>
    %c0_2 = arith.constant 0 : index
    %c0_3 = arith.constant 0 : index
    %2 = vector.load %arg3[%c0_2, %c0_3] : memref<32x128xf32, #tpu.memory_space<vmem>>, vector<32x128xf32>
    %cst = arith.constant dense<0.000000e+00> : vector<8x128xf32>
    %3 = tpu.matmul %1, %2, %cst {dimension_numbers = #tpu.dot_dimension_numbers<[1], [0], [0], [1], [0, 0, 1, 1], [], []>} : vector<8x32xf32>, vector<32x128xf32>, vector<8x128xf32> -> vector<8x128xf32>
    %c0_4 = arith.constant 0 : index
    %c0_5 = arith.constant 0 : index
    %4 = vector.load %arg4[%c0_4, %c0_5] : memref<1x128xf32, #tpu.memory_space<vmem>>, vector<1x128xf32>
    %5 = vector.broadcast %4 : vector<1x128xf32> to vector<8x128xf32>
    %6 = arith.addf %3, %5 : vector<8x128xf32>
    %7 = arith.mulf %6, %6 : vector<8x128xf32>
    %8 = arith.mulf %6, %7 : vector<8x128xf32>
    %cst_6 = arith.constant 4.471500e-02 : f32
    %9 = vector.broadcast %cst_6 : f32 to vector<8x128xf32>
    %10 = arith.mulf %9, %8 : vector<8x128xf32>
    %11 = arith.addf %6, %10 : vector<8x128xf32>
    %cst_7 = arith.constant 0.797884583 : f32
    %12 = vector.broadcast %cst_7 : f32 to vector<8x128xf32>
    %13 = arith.mulf %12, %11 : vector<8x128xf32>
    %14 = math.tanh %13 : vector<8x128xf32>
    %cst_8 = arith.constant 1.000000e+00 : f32
    %15 = vector.broadcast %cst_8 : f32 to vector<8x128xf32>
    %16 = arith.addf %15, %14 : vector<8x128xf32>
    %cst_9 = arith.constant 5.000000e-01 : f32
    %17 = vector.broadcast %cst_9 : f32 to vector<8x128xf32>
    %18 = arith.mulf %17, %16 : vector<8x128xf32>
    %19 = arith.mulf %6, %18 : vector<8x128xf32>
    %c0_10 = arith.constant 0 : index
    %c0_11 = arith.constant 0 : index
    %20 = vector.load %arg5[%c0_10, %c0_11] : memref<128x32xf32, #tpu.memory_space<vmem>>, vector<128x32xf32>
    %cst_12 = arith.constant dense<0.000000e+00> : vector<8x32xf32>
    %21 = tpu.matmul %19, %20, %cst_12 {dimension_numbers = #tpu.dot_dimension_numbers<[1], [0], [0], [1], [0, 0, 1, 1], [], []>} : vector<8x128xf32>, vector<128x32xf32>, vector<8x32xf32> -> vector<8x32xf32>
    %c0_13 = arith.constant 0 : index
    %c0_14 = arith.constant 0 : index
    %22 = vector.load %arg6[%c0_13, %c0_14] : memref<1x32xf32, #tpu.memory_space<vmem>>, vector<1x32xf32>
    %23 = vector.broadcast %22 : vector<1x32xf32> to vector<8x32xf32>
    %24 = arith.addf %21, %23 : vector<8x32xf32>
    %25 = arith.addf %24, %1 : vector<8x32xf32>
    %cst_15 = arith.constant dense<0.000000e+00> : vector<8xf32>
    %26 = vector.multi_reduction <add>, %25, %cst_15 [1] : vector<8x32xf32> to vector<8xf32>
    %27 = vector.shape_cast %26 : vector<8xf32> to vector<8x1xf32>
    %cst_16 = arith.constant 3.200000e+01 : f32
    %28 = vector.broadcast %cst_16 : f32 to vector<8x1xf32>
    %29 = arith.divf %27, %28 : vector<8x1xf32>
    %30 = vector.broadcast %29 : vector<8x1xf32> to vector<8x32xf32>
    %31 = arith.subf %25, %30 : vector<8x32xf32>
    %32 = arith.mulf %31, %31 : vector<8x32xf32>
    %cst_17 = arith.constant dense<0.000000e+00> : vector<8xf32>
    %33 = vector.multi_reduction <add>, %32, %cst_17 [1] : vector<8x32xf32> to vector<8xf32>
    %34 = vector.shape_cast %33 : vector<8xf32> to vector<8x1xf32>
    %cst_18 = arith.constant 3.200000e+01 : f32
    %35 = vector.broadcast %cst_18 : f32 to vector<8x1xf32>
    %36 = arith.divf %34, %35 : vector<8x1xf32>
    %cst_19 = arith.constant 9.99999996E-13 : f32
    %37 = vector.broadcast %cst_19 : f32 to vector<8x1xf32>
    %38 = arith.addf %36, %37 : vector<8x1xf32>
    %39 = math.rsqrt %38 : vector<8x1xf32>
    %40 = vector.broadcast %39 : vector<8x1xf32> to vector<8x32xf32>
    %41 = arith.mulf %31, %40 : vector<8x32xf32>
    %c0_20 = arith.constant 0 : index
    %c0_21 = arith.constant 0 : index
    %42 = vector.load %arg7[%c0_20, %c0_21] : memref<1x32xf32, #tpu.memory_space<vmem>>, vector<1x32xf32>
    %43 = vector.broadcast %42 : vector<1x32xf32> to vector<8x32xf32>
    %44 = arith.mulf %41, %43 : vector<8x32xf32>
    %c0_22 = arith.constant 0 : index
    %c0_23 = arith.constant 0 : index
    %45 = vector.load %arg8[%c0_22, %c0_23] : memref<1x32xf32, #tpu.memory_space<vmem>>, vector<1x32xf32>
    %46 = vector.broadcast %45 : vector<1x32xf32> to vector<8x32xf32>
    %47 = arith.addf %44, %46 : vector<8x32xf32>
    %c0_24 = arith.constant 0 : index
    %c0_25 = arith.constant 0 : index
    %c0_26 = arith.constant 0 : index
    %48 = vector.load %arg9[%c0_24, %c0_25, %c0_26] : memref<1x8x32xf32, #tpu.memory_space<vmem>>, vector<1x8x32xf32>
    %49 = vector.shape_cast %48 : vector<1x8x32xf32> to vector<8x32xf32>
    %50 = vector.shape_cast %47 : vector<8x32xf32> to vector<1x8x32xf32>
    tpu.vector_store %arg9[%c0_24, %c0_25, %c0_26], %50 {strides = array<i32>} : memref<1x8x32xf32, #tpu.memory_space<vmem>>, vector<1x8x32xf32>,
    return
  }
  func.func @transform_0(%arg0: i32, %arg1: i32) -> (i32, i32, i32) {
    %c0_i32 = arith.constant 0 : i32
    %c0_i32_0 = arith.constant 0 : i32
    return %arg0, %arg1, %c0_i32 : i32, i32, i32
  }
  func.func @transform_1(%arg0: i32, %arg1: i32) -> (i32, i32) {
    %c0_i32 = arith.constant 0 : i32
    %c0_i32_0 = arith.constant 0 : i32
    %c0_i32_1 = arith.constant 0 : i32
    return %c0_i32, %c0_i32_0 : i32, i32
  }
  func.func @transform_2(%arg0: i32, %arg1: i32) -> (i32, i32) {
    %c0_i32 = arith.constant 0 : i32
    %c0_i32_0 = arith.constant 0 : i32
    %c0_i32_1 = arith.constant 0 : i32
    return %c0_i32, %c0_i32_0 : i32, i32
  }
  func.func @transform_3(%arg0: i32, %arg1: i32) -> (i32, i32) {
    %c0_i32 = arith.constant 0 : i32
    %c0_i32_0 = arith.constant 0 : i32
    %c0_i32_1 = arith.constant 0 : i32
    return %c0_i32, %c0_i32_0 : i32, i32
  }
  func.func @transform_4(%arg0: i32, %arg1: i32) -> (i32, i32) {
    %c0_i32 = arith.constant 0 : i32
    %c0_i32_0 = arith.constant 0 : i32
    %c0_i32_1 = arith.constant 0 : i32
    return %c0_i32, %c0_i32_0 : i32, i32
  }
  func.func @transform_5(%arg0: i32, %arg1: i32) -> (i32, i32) {
    %c0_i32 = arith.constant 0 : i32
    %c0_i32_0 = arith.constant 0 : i32
    %c0_i32_1 = arith.constant 0 : i32
    return %c0_i32, %c0_i32_0 : i32, i32
  }
  func.func @transform_6(%arg0: i32, %arg1: i32) -> (i32, i32) {
    %c0_i32 = arith.constant 0 : i32
    %c0_i32_0 = arith.constant 0 : i32
    %c0_i32_1 = arith.constant 0 : i32
    return %c0_i32, %c0_i32_0 : i32, i32
  }
  func.func @transform_7(%arg0: i32, %arg1: i32) -> (i32, i32, i32) {
    %c0_i32 = arith.constant 0 : i32
    %c0_i32_0 = arith.constant 0 : i32
    return %arg0, %arg1, %c0_i32 : i32, i32, i32
  }
}

module attributes {stable_mosaic.version = 11 : i64} {
  func.func @_attn_output_kernel(%arg0: i32, %arg1: i32, %arg2: memref<1x8x32xf32, #tpu.memory_space<vmem>>, %arg3: memref<32x96xf32, #tpu.memory_space<vmem>>, %arg4: memref<1x96xf32, #tpu.memory_space<vmem>>, %arg5: memref<1x1x8xf32, #tpu.memory_space<vmem>>, %arg6: memref<32x32xf32, #tpu.memory_space<vmem>>, %arg7: memref<1x32xf32, #tpu.memory_space<vmem>>, %arg8: memref<1x32xf32, #tpu.memory_space<vmem>>, %arg9: memref<1x32xf32, #tpu.memory_space<vmem>>, %arg10: memref<1x8x32xf32, #tpu.memory_space<vmem>>, %arg11: memref<8x32xf32, #tpu.memory_space<vmem>>) attributes {dimension_semantics = [#tpu.dimension_semantics<parallel>, #tpu.dimension_semantics<arbitrary>], iteration_bounds = array<i64: 2, 1>, scalar_prefetch = 0 : i64, scratch_operands = 1 : i64, tpu.core_type = #tpu.core_type<tc>, window_params = [{transform_indices = @transform_0, window_bounds = array<i64: 1, 8, 32>}, {transform_indices = @transform_1, window_bounds = array<i64: 32, 96>}, {transform_indices = @transform_2, window_bounds = array<i64: 1, 96>}, {transform_indices = @transform_3, window_bounds = array<i64: 1, 1, 8>}, {transform_indices = @transform_4, window_bounds = array<i64: 32, 32>}, {pipeline_mode = #tpu.pipeline_mode<synchronous>, transform_indices = @transform_5, window_bounds = array<i64: 1, 32>}, {pipeline_mode = #tpu.pipeline_mode<synchronous>, transform_indices = @transform_6, window_bounds = array<i64: 1, 32>}, {pipeline_mode = #tpu.pipeline_mode<synchronous>, transform_indices = @transform_7, window_bounds = array<i64: 1, 32>}, {transform_indices = @transform_8, window_bounds = array<i64: 1, 8, 32>}]} {
    %c0_i32 = arith.constant 0 : i32
    %0 = arith.cmpi eq, %arg1, %c0_i32 : i32
    %1 = arith.extui %0 : i1 to i32
    %c0_i32_0 = arith.constant 0 : i32
    %2 = arith.cmpi ne, %1, %c0_i32_0 : i32
    scf.if %2 {
      %cst_43 = arith.constant 0.000000e+00 : f32
      %113 = vector.broadcast %cst_43 : f32 to vector<8x32xf32>
      %c0_44 = arith.constant 0 : index
      %c0_45 = arith.constant 0 : index
      %114 = vector.load %arg11[%c0_44, %c0_45] : memref<8x32xf32, #tpu.memory_space<vmem>>, vector<8x32xf32>
      tpu.vector_store %arg11[%c0_44, %c0_45], %113 {strides = array<i32>} : memref<8x32xf32, #tpu.memory_space<vmem>>, vector<8x32xf32>,
    } else {
    }
    %c0 = arith.constant 0 : index
    %c0_1 = arith.constant 0 : index
    %c0_2 = arith.constant 0 : index
    %3 = vector.load %arg2[%c0, %c0_1, %c0_2] : memref<1x8x32xf32, #tpu.memory_space<vmem>>, vector<1x8x32xf32>
    %4 = vector.shape_cast %3 : vector<1x8x32xf32> to vector<8x32xf32>
    %c0_3 = arith.constant 0 : index
    %c0_4 = arith.constant 0 : index
    %5 = vector.load %arg3[%c0_3, %c0_4] : memref<32x96xf32, #tpu.memory_space<vmem>>, vector<32x96xf32>
    %cst = arith.constant dense<0.000000e+00> : vector<8x96xf32>
    %6 = tpu.matmul %4, %5, %cst {dimension_numbers = #tpu.dot_dimension_numbers<[1], [0], [0], [1], [0, 0, 1, 1], [], []>} : vector<8x32xf32>, vector<32x96xf32>, vector<8x96xf32> -> vector<8x96xf32>
    %c0_5 = arith.constant 0 : index
    %c0_6 = arith.constant 0 : index
    %7 = vector.load %arg4[%c0_5, %c0_6] : memref<1x96xf32, #tpu.memory_space<vmem>>, vector<1x96xf32>
    %8 = vector.broadcast %7 : vector<1x96xf32> to vector<8x96xf32>
    %9 = arith.addf %6, %8 : vector<8x96xf32>
    %c0_7 = arith.constant 0 : index
    %c0_8 = arith.constant 0 : index
    %c0_9 = arith.constant 0 : index
    %10 = vector.load %arg5[%c0_7, %c0_8, %c0_9] : memref<1x1x8xf32, #tpu.memory_space<vmem>>, vector<1x1x8xf32>
    %11 = vector.shape_cast %10 : vector<1x1x8xf32> to vector<1x8xf32>
    %12 = vector.extract_strided_slice %9 {offsets = [0, 0], sizes = [8, 8], strides = [1, 1]} : vector<8x96xf32> to vector<8x8xf32>
    %13 = vector.extract_strided_slice %9 {offsets = [0, 32], sizes = [8, 8], strides = [1, 1]} : vector<8x96xf32> to vector<8x8xf32>
    %14 = vector.extract_strided_slice %9 {offsets = [0, 64], sizes = [8, 8], strides = [1, 1]} : vector<8x96xf32> to vector<8x8xf32>
    %cst_10 = arith.constant dense<0.000000e+00> : vector<8x8xf32>
    %15 = tpu.matmul %12, %13, %cst_10 {dimension_numbers = #tpu.dot_dimension_numbers<[1], [1], [0], [0], [0, 0, 1, 0], [], []>} : vector<8x8xf32>, vector<8x8xf32>, vector<8x8xf32> -> vector<8x8xf32>
    %cst_11 = arith.constant 0.353553385 : f32
    %16 = vector.broadcast %cst_11 : f32 to vector<8x8xf32>
    %17 = arith.mulf %15, %16 : vector<8x8xf32>
    %18 = vector.broadcast %11 : vector<1x8xf32> to vector<8x8xf32>
    %19 = arith.addf %17, %18 : vector<8x8xf32>
    %cst_12 = arith.constant dense<0xFF800000> : vector<8xf32>
    %20 = vector.multi_reduction <maximumf>, %19, %cst_12 [1] : vector<8x8xf32> to vector<8xf32>
    %21 = vector.shape_cast %20 : vector<8xf32> to vector<8x1xf32>
    %22 = vector.broadcast %21 : vector<8x1xf32> to vector<8x8xf32>
    %23 = arith.subf %19, %22 : vector<8x8xf32>
    %24 = math.exp %23 : vector<8x8xf32>
    %cst_13 = arith.constant dense<0.000000e+00> : vector<8xf32>
    %25 = vector.multi_reduction <add>, %24, %cst_13 [1] : vector<8x8xf32> to vector<8xf32>
    %26 = vector.shape_cast %25 : vector<8xf32> to vector<8x1xf32>
    %27 = tpu.reciprocal %26 {approx = true} : vector<8x1xf32> -> vector<8x1xf32>
    %28 = arith.mulf %26, %27 : vector<8x1xf32>
    %cst_14 = arith.constant 2.000000e+00 : f32
    %29 = vector.broadcast %cst_14 : f32 to vector<8x1xf32>
    %30 = arith.subf %29, %28 : vector<8x1xf32>
    %31 = arith.mulf %27, %30 : vector<8x1xf32>
    %32 = vector.broadcast %31 : vector<8x1xf32> to vector<8x8xf32>
    %33 = arith.mulf %24, %32 : vector<8x8xf32>
    %cst_15 = arith.constant dense<0.000000e+00> : vector<8x8xf32>
    %34 = tpu.matmul %33, %14, %cst_15 {dimension_numbers = #tpu.dot_dimension_numbers<[1], [0], [0], [1], [0, 0, 1, 1], [], []>} : vector<8x8xf32>, vector<8x8xf32>, vector<8x8xf32> -> vector<8x8xf32>
    %35 = vector.extract_strided_slice %9 {offsets = [0, 8], sizes = [8, 8], strides = [1, 1]} : vector<8x96xf32> to vector<8x8xf32>
    %36 = vector.extract_strided_slice %9 {offsets = [0, 40], sizes = [8, 8], strides = [1, 1]} : vector<8x96xf32> to vector<8x8xf32>
    %37 = vector.extract_strided_slice %9 {offsets = [0, 72], sizes = [8, 8], strides = [1, 1]} : vector<8x96xf32> to vector<8x8xf32>
    %cst_16 = arith.constant dense<0.000000e+00> : vector<8x8xf32>
    %38 = tpu.matmul %35, %36, %cst_16 {dimension_numbers = #tpu.dot_dimension_numbers<[1], [1], [0], [0], [0, 0, 1, 0], [], []>} : vector<8x8xf32>, vector<8x8xf32>, vector<8x8xf32> -> vector<8x8xf32>
    %cst_17 = arith.constant 0.353553385 : f32
    %39 = vector.broadcast %cst_17 : f32 to vector<8x8xf32>
    %40 = arith.mulf %38, %39 : vector<8x8xf32>
    %41 = vector.broadcast %11 : vector<1x8xf32> to vector<8x8xf32>
    %42 = arith.addf %40, %41 : vector<8x8xf32>
    %cst_18 = arith.constant dense<0xFF800000> : vector<8xf32>
    %43 = vector.multi_reduction <maximumf>, %42, %cst_18 [1] : vector<8x8xf32> to vector<8xf32>
    %44 = vector.shape_cast %43 : vector<8xf32> to vector<8x1xf32>
    %45 = vector.broadcast %44 : vector<8x1xf32> to vector<8x8xf32>
    %46 = arith.subf %42, %45 : vector<8x8xf32>
    %47 = math.exp %46 : vector<8x8xf32>
    %cst_19 = arith.constant dense<0.000000e+00> : vector<8xf32>
    %48 = vector.multi_reduction <add>, %47, %cst_19 [1] : vector<8x8xf32> to vector<8xf32>
    %49 = vector.shape_cast %48 : vector<8xf32> to vector<8x1xf32>
    %50 = tpu.reciprocal %49 {approx = true} : vector<8x1xf32> -> vector<8x1xf32>
    %51 = arith.mulf %49, %50 : vector<8x1xf32>
    %cst_20 = arith.constant 2.000000e+00 : f32
    %52 = vector.broadcast %cst_20 : f32 to vector<8x1xf32>
    %53 = arith.subf %52, %51 : vector<8x1xf32>
    %54 = arith.mulf %50, %53 : vector<8x1xf32>
    %55 = vector.broadcast %54 : vector<8x1xf32> to vector<8x8xf32>
    %56 = arith.mulf %47, %55 : vector<8x8xf32>
    %cst_21 = arith.constant dense<0.000000e+00> : vector<8x8xf32>
    %57 = tpu.matmul %56, %37, %cst_21 {dimension_numbers = #tpu.dot_dimension_numbers<[1], [0], [0], [1], [0, 0, 1, 1], [], []>} : vector<8x8xf32>, vector<8x8xf32>, vector<8x8xf32> -> vector<8x8xf32>
    %58 = vector.extract_strided_slice %9 {offsets = [0, 16], sizes = [8, 8], strides = [1, 1]} : vector<8x96xf32> to vector<8x8xf32>
    %59 = vector.extract_strided_slice %9 {offsets = [0, 48], sizes = [8, 8], strides = [1, 1]} : vector<8x96xf32> to vector<8x8xf32>
    %60 = vector.extract_strided_slice %9 {offsets = [0, 80], sizes = [8, 8], strides = [1, 1]} : vector<8x96xf32> to vector<8x8xf32>
    %cst_22 = arith.constant dense<0.000000e+00> : vector<8x8xf32>
    %61 = tpu.matmul %58, %59, %cst_22 {dimension_numbers = #tpu.dot_dimension_numbers<[1], [1], [0], [0], [0, 0, 1, 0], [], []>} : vector<8x8xf32>, vector<8x8xf32>, vector<8x8xf32> -> vector<8x8xf32>
    %cst_23 = arith.constant 0.353553385 : f32
    %62 = vector.broadcast %cst_23 : f32 to vector<8x8xf32>
    %63 = arith.mulf %61, %62 : vector<8x8xf32>
    %64 = vector.broadcast %11 : vector<1x8xf32> to vector<8x8xf32>
    %65 = arith.addf %63, %64 : vector<8x8xf32>
    %cst_24 = arith.constant dense<0xFF800000> : vector<8xf32>
    %66 = vector.multi_reduction <maximumf>, %65, %cst_24 [1] : vector<8x8xf32> to vector<8xf32>
    %67 = vector.shape_cast %66 : vector<8xf32> to vector<8x1xf32>
    %68 = vector.broadcast %67 : vector<8x1xf32> to vector<8x8xf32>
    %69 = arith.subf %65, %68 : vector<8x8xf32>
    %70 = math.exp %69 : vector<8x8xf32>
    %cst_25 = arith.constant dense<0.000000e+00> : vector<8xf32>
    %71 = vector.multi_reduction <add>, %70, %cst_25 [1] : vector<8x8xf32> to vector<8xf32>
    %72 = vector.shape_cast %71 : vector<8xf32> to vector<8x1xf32>
    %73 = tpu.reciprocal %72 {approx = true} : vector<8x1xf32> -> vector<8x1xf32>
    %74 = arith.mulf %72, %73 : vector<8x1xf32>
    %cst_26 = arith.constant 2.000000e+00 : f32
    %75 = vector.broadcast %cst_26 : f32 to vector<8x1xf32>
    %76 = arith.subf %75, %74 : vector<8x1xf32>
    %77 = arith.mulf %73, %76 : vector<8x1xf32>
    %78 = vector.broadcast %77 : vector<8x1xf32> to vector<8x8xf32>
    %79 = arith.mulf %70, %78 : vector<8x8xf32>
    %cst_27 = arith.constant dense<0.000000e+00> : vector<8x8xf32>
    %80 = tpu.matmul %79, %60, %cst_27 {dimension_numbers = #tpu.dot_dimension_numbers<[1], [0], [0], [1], [0, 0, 1, 1], [], []>} : vector<8x8xf32>, vector<8x8xf32>, vector<8x8xf32> -> vector<8x8xf32>
    %81 = vector.extract_strided_slice %9 {offsets = [0, 24], sizes = [8, 8], strides = [1, 1]} : vector<8x96xf32> to vector<8x8xf32>
    %82 = vector.extract_strided_slice %9 {offsets = [0, 56], sizes = [8, 8], strides = [1, 1]} : vector<8x96xf32> to vector<8x8xf32>
    %83 = vector.extract_strided_slice %9 {offsets = [0, 88], sizes = [8, 8], strides = [1, 1]} : vector<8x96xf32> to vector<8x8xf32>
    %cst_28 = arith.constant dense<0.000000e+00> : vector<8x8xf32>
    %84 = tpu.matmul %81, %82, %cst_28 {dimension_numbers = #tpu.dot_dimension_numbers<[1], [1], [0], [0], [0, 0, 1, 0], [], []>} : vector<8x8xf32>, vector<8x8xf32>, vector<8x8xf32> -> vector<8x8xf32>
    %cst_29 = arith.constant 0.353553385 : f32
    %85 = vector.broadcast %cst_29 : f32 to vector<8x8xf32>
    %86 = arith.mulf %84, %85 : vector<8x8xf32>
    %87 = vector.broadcast %11 : vector<1x8xf32> to vector<8x8xf32>
    %88 = arith.addf %86, %87 : vector<8x8xf32>
    %cst_30 = arith.constant dense<0xFF800000> : vector<8xf32>
    %89 = vector.multi_reduction <maximumf>, %88, %cst_30 [1] : vector<8x8xf32> to vector<8xf32>
    %90 = vector.shape_cast %89 : vector<8xf32> to vector<8x1xf32>
    %91 = vector.broadcast %90 : vector<8x1xf32> to vector<8x8xf32>
    %92 = arith.subf %88, %91 : vector<8x8xf32>
    %93 = math.exp %92 : vector<8x8xf32>
    %cst_31 = arith.constant dense<0.000000e+00> : vector<8xf32>
    %94 = vector.multi_reduction <add>, %93, %cst_31 [1] : vector<8x8xf32> to vector<8xf32>
    %95 = vector.shape_cast %94 : vector<8xf32> to vector<8x1xf32>
    %96 = tpu.reciprocal %95 {approx = true} : vector<8x1xf32> -> vector<8x1xf32>
    %97 = arith.mulf %95, %96 : vector<8x1xf32>
    %cst_32 = arith.constant 2.000000e+00 : f32
    %98 = vector.broadcast %cst_32 : f32 to vector<8x1xf32>
    %99 = arith.subf %98, %97 : vector<8x1xf32>
    %100 = arith.mulf %96, %99 : vector<8x1xf32>
    %101 = vector.broadcast %100 : vector<8x1xf32> to vector<8x8xf32>
    %102 = arith.mulf %93, %101 : vector<8x8xf32>
    %cst_33 = arith.constant dense<0.000000e+00> : vector<8x8xf32>
    %103 = tpu.matmul %102, %83, %cst_33 {dimension_numbers = #tpu.dot_dimension_numbers<[1], [0], [0], [1], [0, 0, 1, 1], [], []>} : vector<8x8xf32>, vector<8x8xf32>, vector<8x8xf32> -> vector<8x8xf32>
    %104 = tpu.concatenate %34, %57, %80, %103 in 1 : vector<8x8xf32>, vector<8x8xf32>, vector<8x8xf32>, vector<8x8xf32> -> vector<8x32xf32>
    %c0_34 = arith.constant 0 : index
    %c0_35 = arith.constant 0 : index
    %105 = vector.load %arg11[%c0_34, %c0_35] : memref<8x32xf32, #tpu.memory_space<vmem>>, vector<8x32xf32>
    %c0_36 = arith.constant 0 : index
    %c0_37 = arith.constant 0 : index
    %106 = vector.load %arg6[%c0_36, %c0_37] : memref<32x32xf32, #tpu.memory_space<vmem>>, vector<32x32xf32>
    %cst_38 = arith.constant dense<0.000000e+00> : vector<8x32xf32>
    %107 = tpu.matmul %104, %106, %cst_38 {dimension_numbers = #tpu.dot_dimension_numbers<[1], [0], [0], [1], [0, 0, 1, 1], [], []>} : vector<8x32xf32>, vector<32x32xf32>, vector<8x32xf32> -> vector<8x32xf32>
    %108 = arith.addf %105, %107 : vector<8x32xf32>
    %c0_39 = arith.constant 0 : index
    %c0_40 = arith.constant 0 : index
    %109 = vector.load %arg11[%c0_39, %c0_40] : memref<8x32xf32, #tpu.memory_space<vmem>>, vector<8x32xf32>
    tpu.vector_store %arg11[%c0_39, %c0_40], %108 {strides = array<i32>} : memref<8x32xf32, #tpu.memory_space<vmem>>, vector<8x32xf32>,
    %c0_i32_41 = arith.constant 0 : i32
    %110 = arith.cmpi eq, %arg1, %c0_i32_41 : i32
    %111 = arith.extui %110 : i1 to i32
    %c0_i32_42 = arith.constant 0 : i32
    %112 = arith.cmpi ne, %111, %c0_i32_42 : i32
    scf.if %112 {
      %c0_43 = arith.constant 0 : index
      %c0_44 = arith.constant 0 : index
      %113 = vector.load %arg11[%c0_43, %c0_44] : memref<8x32xf32, #tpu.memory_space<vmem>>, vector<8x32xf32>
      %c0_45 = arith.constant 0 : index
      %c0_46 = arith.constant 0 : index
      %114 = vector.load %arg7[%c0_45, %c0_46] : memref<1x32xf32, #tpu.memory_space<vmem>>, vector<1x32xf32>
      %115 = vector.broadcast %114 : vector<1x32xf32> to vector<8x32xf32>
      %116 = arith.addf %113, %115 : vector<8x32xf32>
      %c0_47 = arith.constant 0 : index
      %c0_48 = arith.constant 0 : index
      %c0_49 = arith.constant 0 : index
      %117 = vector.load %arg2[%c0_47, %c0_48, %c0_49] : memref<1x8x32xf32, #tpu.memory_space<vmem>>, vector<1x8x32xf32>
      %118 = vector.shape_cast %117 : vector<1x8x32xf32> to vector<8x32xf32>
      %119 = arith.addf %116, %118 : vector<8x32xf32>
      %cst_50 = arith.constant dense<0.000000e+00> : vector<8xf32>
      %120 = vector.multi_reduction <add>, %119, %cst_50 [1] : vector<8x32xf32> to vector<8xf32>
      %121 = vector.shape_cast %120 : vector<8xf32> to vector<8x1xf32>
      %cst_51 = arith.constant 3.200000e+01 : f32
      %122 = vector.broadcast %cst_51 : f32 to vector<8x1xf32>
      %123 = arith.divf %121, %122 : vector<8x1xf32>
      %124 = vector.broadcast %123 : vector<8x1xf32> to vector<8x32xf32>
      %125 = arith.subf %119, %124 : vector<8x32xf32>
      %126 = arith.mulf %125, %125 : vector<8x32xf32>
      %cst_52 = arith.constant dense<0.000000e+00> : vector<8xf32>
      %127 = vector.multi_reduction <add>, %126, %cst_52 [1] : vector<8x32xf32> to vector<8xf32>
      %128 = vector.shape_cast %127 : vector<8xf32> to vector<8x1xf32>
      %cst_53 = arith.constant 3.200000e+01 : f32
      %129 = vector.broadcast %cst_53 : f32 to vector<8x1xf32>
      %130 = arith.divf %128, %129 : vector<8x1xf32>
      %cst_54 = arith.constant 9.99999996E-13 : f32
      %131 = vector.broadcast %cst_54 : f32 to vector<8x1xf32>
      %132 = arith.addf %130, %131 : vector<8x1xf32>
      %133 = math.rsqrt %132 : vector<8x1xf32>
      %134 = vector.broadcast %133 : vector<8x1xf32> to vector<8x32xf32>
      %135 = arith.mulf %125, %134 : vector<8x32xf32>
      %c0_55 = arith.constant 0 : index
      %c0_56 = arith.constant 0 : index
      %136 = vector.load %arg8[%c0_55, %c0_56] : memref<1x32xf32, #tpu.memory_space<vmem>>, vector<1x32xf32>
      %137 = vector.broadcast %136 : vector<1x32xf32> to vector<8x32xf32>
      %138 = arith.mulf %135, %137 : vector<8x32xf32>
      %c0_57 = arith.constant 0 : index
      %c0_58 = arith.constant 0 : index
      %139 = vector.load %arg9[%c0_57, %c0_58] : memref<1x32xf32, #tpu.memory_space<vmem>>, vector<1x32xf32>
      %140 = vector.broadcast %139 : vector<1x32xf32> to vector<8x32xf32>
      %141 = arith.addf %138, %140 : vector<8x32xf32>
      %c0_59 = arith.constant 0 : index
      %c0_60 = arith.constant 0 : index
      %c0_61 = arith.constant 0 : index
      %142 = vector.load %arg10[%c0_59, %c0_60, %c0_61] : memref<1x8x32xf32, #tpu.memory_space<vmem>>, vector<1x8x32xf32>
      %143 = vector.shape_cast %142 : vector<1x8x32xf32> to vector<8x32xf32>
      %144 = vector.shape_cast %141 : vector<8x32xf32> to vector<1x8x32xf32>
      tpu.vector_store %arg10[%c0_59, %c0_60, %c0_61], %144 {strides = array<i32>} : memref<1x8x32xf32, #tpu.memory_space<vmem>>, vector<1x8x32xf32>,
    } else {
    }
    return
  }
  func.func @transform_0(%arg0: i32, %arg1: i32) -> (i32, i32, i32) {
    %c0_i32 = arith.constant 0 : i32
    %c0_i32_0 = arith.constant 0 : i32
    %c0_i32_1 = arith.constant 0 : i32
    return %arg0, %c0_i32, %c0_i32_0 : i32, i32, i32
  }
  func.func @transform_1(%arg0: i32, %arg1: i32) -> (i32, i32) {
    %c0_i32 = arith.constant 0 : i32
    %c0_i32_0 = arith.constant 0 : i32
    return %c0_i32, %arg1 : i32, i32
  }
  func.func @transform_2(%arg0: i32, %arg1: i32) -> (i32, i32) {
    %c0_i32 = arith.constant 0 : i32
    %c0_i32_0 = arith.constant 0 : i32
    return %c0_i32, %arg1 : i32, i32
  }
  func.func @transform_3(%arg0: i32, %arg1: i32) -> (i32, i32, i32) {
    %c0_i32 = arith.constant 0 : i32
    %c0_i32_0 = arith.constant 0 : i32
    %c0_i32_1 = arith.constant 0 : i32
    return %arg0, %c0_i32, %c0_i32_0 : i32, i32, i32
  }
  func.func @transform_4(%arg0: i32, %arg1: i32) -> (i32, i32) {
    %c0_i32 = arith.constant 0 : i32
    %c0_i32_0 = arith.constant 0 : i32
    return %arg1, %c0_i32 : i32, i32
  }
  func.func @transform_5(%arg0: i32, %arg1: i32) -> (i32, i32) {
    %c0_i32 = arith.constant 0 : i32
    %c0_i32_0 = arith.constant 0 : i32
    %c0_i32_1 = arith.constant 0 : i32
    return %c0_i32, %c0_i32_0 : i32, i32
  }
  func.func @transform_6(%arg0: i32, %arg1: i32) -> (i32, i32) {
    %c0_i32 = arith.constant 0 : i32
    %c0_i32_0 = arith.constant 0 : i32
    %c0_i32_1 = arith.constant 0 : i32
    return %c0_i32, %c0_i32_0 : i32, i32
  }
  func.func @transform_7(%arg0: i32, %arg1: i32) -> (i32, i32) {
    %c0_i32 = arith.constant 0 : i32
    %c0_i32_0 = arith.constant 0 : i32
    %c0_i32_1 = arith.constant 0 : i32
    return %c0_i32, %c0_i32_0 : i32, i32
  }
  func.func @transform_8(%arg0: i32, %arg1: i32) -> (i32, i32, i32) {
    %c0_i32 = arith.constant 0 : i32
    %c0_i32_0 = arith.constant 0 : i32
    %c0_i32_1 = arith.constant 0 : i32
    return %arg0, %c0_i32, %c0_i32_0 : i32, i32, i32
  }
}

module attributes {stable_mosaic.version = 11 : i64} {
  func.func @_attn_output_kernel(%arg0: i32, %arg1: i32, %arg2: memref<1x8x32xf32, #tpu.memory_space<vmem>>, %arg3: memref<32x96xf32, #tpu.memory_space<vmem>>, %arg4: memref<1x96xf32, #tpu.memory_space<vmem>>, %arg5: memref<1x1x8xf32, #tpu.memory_space<vmem>>, %arg6: memref<32x32xf32, #tpu.memory_space<vmem>>, %arg7: memref<1x32xf32, #tpu.memory_space<vmem>>, %arg8: memref<1x32xf32, #tpu.memory_space<vmem>>, %arg9: memref<1x32xf32, #tpu.memory_space<vmem>>, %arg10: memref<1x8x32xf32, #tpu.memory_space<vmem>>, %arg11: memref<8x32xf32, #tpu.memory_space<vmem>>) attributes {dimension_semantics = [#tpu.dimension_semantics<parallel>, #tpu.dimension_semantics<arbitrary>], iteration_bounds = array<i64: 2, 1>, scalar_prefetch = 0 : i64, scratch_operands = 1 : i64, tpu.core_type = #tpu.core_type<tc>, window_params = [{transform_indices = @transform_0, window_bounds = array<i64: 1, 8, 32>}, {transform_indices = @transform_1, window_bounds = array<i64: 32, 96>}, {transform_indices = @transform_2, window_bounds = array<i64: 1, 96>}, {transform_indices = @transform_3, window_bounds = array<i64: 1, 1, 8>}, {transform_indices = @transform_4, window_bounds = array<i64: 32, 32>}, {pipeline_mode = #tpu.pipeline_mode<synchronous>, transform_indices = @transform_5, window_bounds = array<i64: 1, 32>}, {pipeline_mode = #tpu.pipeline_mode<synchronous>, transform_indices = @transform_6, window_bounds = array<i64: 1, 32>}, {pipeline_mode = #tpu.pipeline_mode<synchronous>, transform_indices = @transform_7, window_bounds = array<i64: 1, 32>}, {transform_indices = @transform_8, window_bounds = array<i64: 1, 8, 32>}]} {
    %c0_i32 = arith.constant 0 : i32
    %0 = arith.cmpi eq, %arg1, %c0_i32 : i32
    %1 = arith.extui %0 : i1 to i32
    %c0_i32_0 = arith.constant 0 : i32
    %2 = arith.cmpi ne, %1, %c0_i32_0 : i32
    scf.if %2 {
      %cst_43 = arith.constant 0.000000e+00 : f32
      %113 = vector.broadcast %cst_43 : f32 to vector<8x32xf32>
      %c0_44 = arith.constant 0 : index
      %c0_45 = arith.constant 0 : index
      %114 = vector.load %arg11[%c0_44, %c0_45] : memref<8x32xf32, #tpu.memory_space<vmem>>, vector<8x32xf32>
      tpu.vector_store %arg11[%c0_44, %c0_45], %113 {strides = array<i32>} : memref<8x32xf32, #tpu.memory_space<vmem>>, vector<8x32xf32>,
    } else {
    }
    %c0 = arith.constant 0 : index
    %c0_1 = arith.constant 0 : index
    %c0_2 = arith.constant 0 : index
    %3 = vector.load %arg2[%c0, %c0_1, %c0_2] : memref<1x8x32xf32, #tpu.memory_space<vmem>>, vector<1x8x32xf32>
    %4 = vector.shape_cast %3 : vector<1x8x32xf32> to vector<8x32xf32>
    %c0_3 = arith.constant 0 : index
    %c0_4 = arith.constant 0 : index
    %5 = vector.load %arg3[%c0_3, %c0_4] : memref<32x96xf32, #tpu.memory_space<vmem>>, vector<32x96xf32>
    %cst = arith.constant dense<0.000000e+00> : vector<8x96xf32>
    %6 = tpu.matmul %4, %5, %cst {dimension_numbers = #tpu.dot_dimension_numbers<[1], [0], [0], [1], [0, 0, 1, 1], [], []>} : vector<8x32xf32>, vector<32x96xf32>, vector<8x96xf32> -> vector<8x96xf32>
    %c0_5 = arith.constant 0 : index
    %c0_6 = arith.constant 0 : index
    %7 = vector.load %arg4[%c0_5, %c0_6] : memref<1x96xf32, #tpu.memory_space<vmem>>, vector<1x96xf32>
    %8 = vector.broadcast %7 : vector<1x96xf32> to vector<8x96xf32>
    %9 = arith.addf %6, %8 : vector<8x96xf32>
    %c0_7 = arith.constant 0 : index
    %c0_8 = arith.constant 0 : index
    %c0_9 = arith.constant 0 : index
    %10 = vector.load %arg5[%c0_7, %c0_8, %c0_9] : memref<1x1x8xf32, #tpu.memory_space<vmem>>, vector<1x1x8xf32>
    %11 = vector.shape_cast %10 : vector<1x1x8xf32> to vector<1x8xf32>
    %12 = vector.extract_strided_slice %9 {offsets = [0, 0], sizes = [8, 8], strides = [1, 1]} : vector<8x96xf32> to vector<8x8xf32>
    %13 = vector.extract_strided_slice %9 {offsets = [0, 32], sizes = [8, 8], strides = [1, 1]} : vector<8x96xf32> to vector<8x8xf32>
    %14 = vector.extract_strided_slice %9 {offsets = [0, 64], sizes = [8, 8], strides = [1, 1]} : vector<8x96xf32> to vector<8x8xf32>
    %cst_10 = arith.constant dense<0.000000e+00> : vector<8x8xf32>
    %15 = tpu.matmul %12, %13, %cst_10 {dimension_numbers = #tpu.dot_dimension_numbers<[1], [1], [0], [0], [0, 0, 1, 0], [], []>} : vector<8x8xf32>, vector<8x8xf32>, vector<8x8xf32> -> vector<8x8xf32>
    %cst_11 = arith.constant 0.353553385 : f32
    %16 = vector.broadcast %cst_11 : f32 to vector<8x8xf32>
    %17 = arith.mulf %15, %16 : vector<8x8xf32>
    %18 = vector.broadcast %11 : vector<1x8xf32> to vector<8x8xf32>
    %19 = arith.addf %17, %18 : vector<8x8xf32>
    %cst_12 = arith.constant dense<0xFF800000> : vector<8xf32>
    %20 = vector.multi_reduction <maximumf>, %19, %cst_12 [1] : vector<8x8xf32> to vector<8xf32>
    %21 = vector.shape_cast %20 : vector<8xf32> to vector<8x1xf32>
    %22 = vector.broadcast %21 : vector<8x1xf32> to vector<8x8xf32>
    %23 = arith.subf %19, %22 : vector<8x8xf32>
    %24 = math.exp %23 : vector<8x8xf32>
    %cst_13 = arith.constant dense<0.000000e+00> : vector<8xf32>
    %25 = vector.multi_reduction <add>, %24, %cst_13 [1] : vector<8x8xf32> to vector<8xf32>
    %26 = vector.shape_cast %25 : vector<8xf32> to vector<8x1xf32>
    %27 = tpu.reciprocal %26 {approx = true} : vector<8x1xf32> -> vector<8x1xf32>
    %28 = arith.mulf %26, %27 : vector<8x1xf32>
    %cst_14 = arith.constant 2.000000e+00 : f32
    %29 = vector.broadcast %cst_14 : f32 to vector<8x1xf32>
    %30 = arith.subf %29, %28 : vector<8x1xf32>
    %31 = arith.mulf %27, %30 : vector<8x1xf32>
    %32 = vector.broadcast %31 : vector<8x1xf32> to vector<8x8xf32>
    %33 = arith.mulf %24, %32 : vector<8x8xf32>
    %cst_15 = arith.constant dense<0.000000e+00> : vector<8x8xf32>
    %34 = tpu.matmul %33, %14, %cst_15 {dimension_numbers = #tpu.dot_dimension_numbers<[1], [0], [0], [1], [0, 0, 1, 1], [], []>} : vector<8x8xf32>, vector<8x8xf32>, vector<8x8xf32> -> vector<8x8xf32>
    %35 = vector.extract_strided_slice %9 {offsets = [0, 8], sizes = [8, 8], strides = [1, 1]} : vector<8x96xf32> to vector<8x8xf32>
    %36 = vector.extract_strided_slice %9 {offsets = [0, 40], sizes = [8, 8], strides = [1, 1]} : vector<8x96xf32> to vector<8x8xf32>
    %37 = vector.extract_strided_slice %9 {offsets = [0, 72], sizes = [8, 8], strides = [1, 1]} : vector<8x96xf32> to vector<8x8xf32>
    %cst_16 = arith.constant dense<0.000000e+00> : vector<8x8xf32>
    %38 = tpu.matmul %35, %36, %cst_16 {dimension_numbers = #tpu.dot_dimension_numbers<[1], [1], [0], [0], [0, 0, 1, 0], [], []>} : vector<8x8xf32>, vector<8x8xf32>, vector<8x8xf32> -> vector<8x8xf32>
    %cst_17 = arith.constant 0.353553385 : f32
    %39 = vector.broadcast %cst_17 : f32 to vector<8x8xf32>
    %40 = arith.mulf %38, %39 : vector<8x8xf32>
    %41 = vector.broadcast %11 : vector<1x8xf32> to vector<8x8xf32>
    %42 = arith.addf %40, %41 : vector<8x8xf32>
    %cst_18 = arith.constant dense<0xFF800000> : vector<8xf32>
    %43 = vector.multi_reduction <maximumf>, %42, %cst_18 [1] : vector<8x8xf32> to vector<8xf32>
    %44 = vector.shape_cast %43 : vector<8xf32> to vector<8x1xf32>
    %45 = vector.broadcast %44 : vector<8x1xf32> to vector<8x8xf32>
    %46 = arith.subf %42, %45 : vector<8x8xf32>
    %47 = math.exp %46 : vector<8x8xf32>
    %cst_19 = arith.constant dense<0.000000e+00> : vector<8xf32>
    %48 = vector.multi_reduction <add>, %47, %cst_19 [1] : vector<8x8xf32> to vector<8xf32>
    %49 = vector.shape_cast %48 : vector<8xf32> to vector<8x1xf32>
    %50 = tpu.reciprocal %49 {approx = true} : vector<8x1xf32> -> vector<8x1xf32>
    %51 = arith.mulf %49, %50 : vector<8x1xf32>
    %cst_20 = arith.constant 2.000000e+00 : f32
    %52 = vector.broadcast %cst_20 : f32 to vector<8x1xf32>
    %53 = arith.subf %52, %51 : vector<8x1xf32>
    %54 = arith.mulf %50, %53 : vector<8x1xf32>
    %55 = vector.broadcast %54 : vector<8x1xf32> to vector<8x8xf32>
    %56 = arith.mulf %47, %55 : vector<8x8xf32>
    %cst_21 = arith.constant dense<0.000000e+00> : vector<8x8xf32>
    %57 = tpu.matmul %56, %37, %cst_21 {dimension_numbers = #tpu.dot_dimension_numbers<[1], [0], [0], [1], [0, 0, 1, 1], [], []>} : vector<8x8xf32>, vector<8x8xf32>, vector<8x8xf32> -> vector<8x8xf32>
    %58 = vector.extract_strided_slice %9 {offsets = [0, 16], sizes = [8, 8], strides = [1, 1]} : vector<8x96xf32> to vector<8x8xf32>
    %59 = vector.extract_strided_slice %9 {offsets = [0, 48], sizes = [8, 8], strides = [1, 1]} : vector<8x96xf32> to vector<8x8xf32>
    %60 = vector.extract_strided_slice %9 {offsets = [0, 80], sizes = [8, 8], strides = [1, 1]} : vector<8x96xf32> to vector<8x8xf32>
    %cst_22 = arith.constant dense<0.000000e+00> : vector<8x8xf32>
    %61 = tpu.matmul %58, %59, %cst_22 {dimension_numbers = #tpu.dot_dimension_numbers<[1], [1], [0], [0], [0, 0, 1, 0], [], []>} : vector<8x8xf32>, vector<8x8xf32>, vector<8x8xf32> -> vector<8x8xf32>
    %cst_23 = arith.constant 0.353553385 : f32
    %62 = vector.broadcast %cst_23 : f32 to vector<8x8xf32>
    %63 = arith.mulf %61, %62 : vector<8x8xf32>
    %64 = vector.broadcast %11 : vector<1x8xf32> to vector<8x8xf32>
    %65 = arith.addf %63, %64 : vector<8x8xf32>
    %cst_24 = arith.constant dense<0xFF800000> : vector<8xf32>
    %66 = vector.multi_reduction <maximumf>, %65, %cst_24 [1] : vector<8x8xf32> to vector<8xf32>
    %67 = vector.shape_cast %66 : vector<8xf32> to vector<8x1xf32>
    %68 = vector.broadcast %67 : vector<8x1xf32> to vector<8x8xf32>
    %69 = arith.subf %65, %68 : vector<8x8xf32>
    %70 = math.exp %69 : vector<8x8xf32>
    %cst_25 = arith.constant dense<0.000000e+00> : vector<8xf32>
    %71 = vector.multi_reduction <add>, %70, %cst_25 [1] : vector<8x8xf32> to vector<8xf32>
    %72 = vector.shape_cast %71 : vector<8xf32> to vector<8x1xf32>
    %73 = tpu.reciprocal %72 {approx = true} : vector<8x1xf32> -> vector<8x1xf32>
    %74 = arith.mulf %72, %73 : vector<8x1xf32>
    %cst_26 = arith.constant 2.000000e+00 : f32
    %75 = vector.broadcast %cst_26 : f32 to vector<8x1xf32>
    %76 = arith.subf %75, %74 : vector<8x1xf32>
    %77 = arith.mulf %73, %76 : vector<8x1xf32>
    %78 = vector.broadcast %77 : vector<8x1xf32> to vector<8x8xf32>
    %79 = arith.mulf %70, %78 : vector<8x8xf32>
    %cst_27 = arith.constant dense<0.000000e+00> : vector<8x8xf32>
    %80 = tpu.matmul %79, %60, %cst_27 {dimension_numbers = #tpu.dot_dimension_numbers<[1], [0], [0], [1], [0, 0, 1, 1], [], []>} : vector<8x8xf32>, vector<8x8xf32>, vector<8x8xf32> -> vector<8x8xf32>
    %81 = vector.extract_strided_slice %9 {offsets = [0, 24], sizes = [8, 8], strides = [1, 1]} : vector<8x96xf32> to vector<8x8xf32>
    %82 = vector.extract_strided_slice %9 {offsets = [0, 56], sizes = [8, 8], strides = [1, 1]} : vector<8x96xf32> to vector<8x8xf32>
    %83 = vector.extract_strided_slice %9 {offsets = [0, 88], sizes = [8, 8], strides = [1, 1]} : vector<8x96xf32> to vector<8x8xf32>
    %cst_28 = arith.constant dense<0.000000e+00> : vector<8x8xf32>
    %84 = tpu.matmul %81, %82, %cst_28 {dimension_numbers = #tpu.dot_dimension_numbers<[1], [1], [0], [0], [0, 0, 1, 0], [], []>} : vector<8x8xf32>, vector<8x8xf32>, vector<8x8xf32> -> vector<8x8xf32>
    %cst_29 = arith.constant 0.353553385 : f32
    %85 = vector.broadcast %cst_29 : f32 to vector<8x8xf32>
    %86 = arith.mulf %84, %85 : vector<8x8xf32>
    %87 = vector.broadcast %11 : vector<1x8xf32> to vector<8x8xf32>
    %88 = arith.addf %86, %87 : vector<8x8xf32>
    %cst_30 = arith.constant dense<0xFF800000> : vector<8xf32>
    %89 = vector.multi_reduction <maximumf>, %88, %cst_30 [1] : vector<8x8xf32> to vector<8xf32>
    %90 = vector.shape_cast %89 : vector<8xf32> to vector<8x1xf32>
    %91 = vector.broadcast %90 : vector<8x1xf32> to vector<8x8xf32>
    %92 = arith.subf %88, %91 : vector<8x8xf32>
    %93 = math.exp %92 : vector<8x8xf32>
    %cst_31 = arith.constant dense<0.000000e+00> : vector<8xf32>
    %94 = vector.multi_reduction <add>, %93, %cst_31 [1] : vector<8x8xf32> to vector<8xf32>
    %95 = vector.shape_cast %94 : vector<8xf32> to vector<8x1xf32>
    %96 = tpu.reciprocal %95 {approx = true} : vector<8x1xf32> -> vector<8x1xf32>
    %97 = arith.mulf %95, %96 : vector<8x1xf32>
    %cst_32 = arith.constant 2.000000e+00 : f32
    %98 = vector.broadcast %cst_32 : f32 to vector<8x1xf32>
    %99 = arith.subf %98, %97 : vector<8x1xf32>
    %100 = arith.mulf %96, %99 : vector<8x1xf32>
    %101 = vector.broadcast %100 : vector<8x1xf32> to vector<8x8xf32>
    %102 = arith.mulf %93, %101 : vector<8x8xf32>
    %cst_33 = arith.constant dense<0.000000e+00> : vector<8x8xf32>
    %103 = tpu.matmul %102, %83, %cst_33 {dimension_numbers = #tpu.dot_dimension_numbers<[1], [0], [0], [1], [0, 0, 1, 1], [], []>} : vector<8x8xf32>, vector<8x8xf32>, vector<8x8xf32> -> vector<8x8xf32>
    %104 = tpu.concatenate %34, %57, %80, %103 in 1 : vector<8x8xf32>, vector<8x8xf32>, vector<8x8xf32>, vector<8x8xf32> -> vector<8x32xf32>
    %c0_34 = arith.constant 0 : index
    %c0_35 = arith.constant 0 : index
    %105 = vector.load %arg11[%c0_34, %c0_35] : memref<8x32xf32, #tpu.memory_space<vmem>>, vector<8x32xf32>
    %c0_36 = arith.constant 0 : index
    %c0_37 = arith.constant 0 : index
    %106 = vector.load %arg6[%c0_36, %c0_37] : memref<32x32xf32, #tpu.memory_space<vmem>>, vector<32x32xf32>
    %cst_38 = arith.constant dense<0.000000e+00> : vector<8x32xf32>
    %107 = tpu.matmul %104, %106, %cst_38 {dimension_numbers = #tpu.dot_dimension_numbers<[1], [0], [0], [1], [0, 0, 1, 1], [], []>} : vector<8x32xf32>, vector<32x32xf32>, vector<8x32xf32> -> vector<8x32xf32>
    %108 = arith.addf %105, %107 : vector<8x32xf32>
    %c0_39 = arith.constant 0 : index
    %c0_40 = arith.constant 0 : index
    %109 = vector.load %arg11[%c0_39, %c0_40] : memref<8x32xf32, #tpu.memory_space<vmem>>, vector<8x32xf32>
    tpu.vector_store %arg11[%c0_39, %c0_40], %108 {strides = array<i32>} : memref<8x32xf32, #tpu.memory_space<vmem>>, vector<8x32xf32>,
    %c0_i32_41 = arith.constant 0 : i32
    %110 = arith.cmpi eq, %arg1, %c0_i32_41 : i32
    %111 = arith.extui %110 : i1 to i32
    %c0_i32_42 = arith.constant 0 : i32
    %112 = arith.cmpi ne, %111, %c0_i32_42 : i32
    scf.if %112 {
      %c0_43 = arith.constant 0 : index
      %c0_44 = arith.constant 0 : index
      %113 = vector.load %arg11[%c0_43, %c0_44] : memref<8x32xf32, #tpu.memory_space<vmem>>, vector<8x32xf32>
      %c0_45 = arith.constant 0 : index
      %c0_46 = arith.constant 0 : index
      %114 = vector.load %arg7[%c0_45, %c0_46] : memref<1x32xf32, #tpu.memory_space<vmem>>, vector<1x32xf32>
      %115 = vector.broadcast %114 : vector<1x32xf32> to vector<8x32xf32>
      %116 = arith.addf %113, %115 : vector<8x32xf32>
      %c0_47 = arith.constant 0 : index
      %c0_48 = arith.constant 0 : index
      %c0_49 = arith.constant 0 : index
      %117 = vector.load %arg2[%c0_47, %c0_48, %c0_49] : memref<1x8x32xf32, #tpu.memory_space<vmem>>, vector<1x8x32xf32>
      %118 = vector.shape_cast %117 : vector<1x8x32xf32> to vector<8x32xf32>
      %119 = arith.addf %116, %118 : vector<8x32xf32>
      %cst_50 = arith.constant dense<0.000000e+00> : vector<8xf32>
      %120 = vector.multi_reduction <add>, %119, %cst_50 [1] : vector<8x32xf32> to vector<8xf32>
      %121 = vector.shape_cast %120 : vector<8xf32> to vector<8x1xf32>
      %cst_51 = arith.constant 3.200000e+01 : f32
      %122 = vector.broadcast %cst_51 : f32 to vector<8x1xf32>
      %123 = arith.divf %121, %122 : vector<8x1xf32>
      %124 = vector.broadcast %123 : vector<8x1xf32> to vector<8x32xf32>
      %125 = arith.subf %119, %124 : vector<8x32xf32>
      %126 = arith.mulf %125, %125 : vector<8x32xf32>
      %cst_52 = arith.constant dense<0.000000e+00> : vector<8xf32>
      %127 = vector.multi_reduction <add>, %126, %cst_52 [1] : vector<8x32xf32> to vector<8xf32>
      %128 = vector.shape_cast %127 : vector<8xf32> to vector<8x1xf32>
      %cst_53 = arith.constant 3.200000e+01 : f32
      %129 = vector.broadcast %cst_53 : f32 to vector<8x1xf32>
      %130 = arith.divf %128, %129 : vector<8x1xf32>
      %cst_54 = arith.constant 9.99999996E-13 : f32
      %131 = vector.broadcast %cst_54 : f32 to vector<8x1xf32>
      %132 = arith.addf %130, %131 : vector<8x1xf32>
      %133 = math.rsqrt %132 : vector<8x1xf32>
      %134 = vector.broadcast %133 : vector<8x1xf32> to vector<8x32xf32>
      %135 = arith.mulf %125, %134 : vector<8x32xf32>
      %c0_55 = arith.constant 0 : index
      %c0_56 = arith.constant 0 : index
      %136 = vector.load %arg8[%c0_55, %c0_56] : memref<1x32xf32, #tpu.memory_space<vmem>>, vector<1x32xf32>
      %137 = vector.broadcast %136 : vector<1x32xf32> to vector<8x32xf32>
      %138 = arith.mulf %135, %137 : vector<8x32xf32>
      %c0_57 = arith.constant 0 : index
      %c0_58 = arith.constant 0 : index
      %139 = vector.load %arg9[%c0_57, %c0_58] : memref<1x32xf32, #tpu.memory_space<vmem>>, vector<1x32xf32>
      %140 = vector.broadcast %139 : vector<1x32xf32> to vector<8x32xf32>
      %141 = arith.addf %138, %140 : vector<8x32xf32>
      %c0_59 = arith.constant 0 : index
      %c0_60 = arith.constant 0 : index
      %c0_61 = arith.constant 0 : index
      %142 = vector.load %arg10[%c0_59, %c0_60, %c0_61] : memref<1x8x32xf32, #tpu.memory_space<vmem>>, vector<1x8x32xf32>
      %143 = vector.shape_cast %142 : vector<1x8x32xf32> to vector<8x32xf32>
      %144 = vector.shape_cast %141 : vector<8x32xf32> to vector<1x8x32xf32>
      tpu.vector_store %arg10[%c0_59, %c0_60, %c0_61], %144 {strides = array<i32>} : memref<1x8x32xf32, #tpu.memory_space<vmem>>, vector<1x8x32xf32>,
    } else {
    }
    return
  }
  func.func @transform_0(%arg0: i32, %arg1: i32) -> (i32, i32, i32) {
    %c0_i32 = arith.constant 0 : i32
    %c0_i32_0 = arith.constant 0 : i32
    %c0_i32_1 = arith.constant 0 : i32
    return %arg0, %c0_i32, %c0_i32_0 : i32, i32, i32
  }
  func.func @transform_1(%arg0: i32, %arg1: i32) -> (i32, i32) {
    %c0_i32 = arith.constant 0 : i32
    %c0_i32_0 = arith.constant 0 : i32
    return %c0_i32, %arg1 : i32, i32
  }
  func.func @transform_2(%arg0: i32, %arg1: i32) -> (i32, i32) {
    %c0_i32 = arith.constant 0 : i32
    %c0_i32_0 = arith.constant 0 : i32
    return %c0_i32, %arg1 : i32, i32
  }
  func.func @transform_3(%arg0: i32, %arg1: i32) -> (i32, i32, i32) {
    %c0_i32 = arith.constant 0 : i32
    %c0_i32_0 = arith.constant 0 : i32
    %c0_i32_1 = arith.constant 0 : i32
    return %arg0, %c0_i32, %c0_i32_0 : i32, i32, i32
  }
  func.func @transform_4(%arg0: i32, %arg1: i32) -> (i32, i32) {
    %c0_i32 = arith.constant 0 : i32
    %c0_i32_0 = arith.constant 0 : i32
    return %arg1, %c0_i32 : i32, i32
  }
  func.func @transform_5(%arg0: i32, %arg1: i32) -> (i32, i32) {
    %c0_i32 = arith.constant 0 : i32
    %c0_i32_0 = arith.constant 0 : i32
    %c0_i32_1 = arith.constant 0 : i32
    return %c0_i32, %c0_i32_0 : i32, i32
  }
  func.func @transform_6(%arg0: i32, %arg1: i32) -> (i32, i32) {
    %c0_i32 = arith.constant 0 : i32
    %c0_i32_0 = arith.constant 0 : i32
    %c0_i32_1 = arith.constant 0 : i32
    return %c0_i32, %c0_i32_0 : i32, i32
  }
  func.func @transform_7(%arg0: i32, %arg1: i32) -> (i32, i32) {
    %c0_i32 = arith.constant 0 : i32
    %c0_i32_0 = arith.constant 0 : i32
    %c0_i32_1 = arith.constant 0 : i32
    return %c0_i32, %c0_i32_0 : i32, i32
  }
  func.func @transform_8(%arg0: i32, %arg1: i32) -> (i32, i32, i32) {
    %c0_i32 = arith.constant 0 : i32
    %c0_i32_0 = arith.constant 0 : i32
    %c0_i32_1 = arith.constant 0 : i32
    return %arg0, %c0_i32, %c0_i32_0 : i32, i32, i32
  }
}

module attributes {stable_mosaic.version = 11 : i64} {
  func.func @_ffn_kernel(%arg0: i32, %arg1: i32, %arg2: memref<1x8x32xf32, #tpu.memory_space<vmem>>, %arg3: memref<32x128xf32, #tpu.memory_space<vmem>>, %arg4: memref<1x128xf32, #tpu.memory_space<vmem>>, %arg5: memref<128x32xf32, #tpu.memory_space<vmem>>, %arg6: memref<1x32xf32, #tpu.memory_space<vmem>>, %arg7: memref<1x32xf32, #tpu.memory_space<vmem>>, %arg8: memref<1x32xf32, #tpu.memory_space<vmem>>, %arg9: memref<1x8x32xf32, #tpu.memory_space<vmem>>) attributes {dimension_semantics = [#tpu.dimension_semantics<parallel>, #tpu.dimension_semantics<parallel>], iteration_bounds = array<i64: 2, 1>, scalar_prefetch = 0 : i64, scratch_operands = 0 : i64, tpu.core_type = #tpu.core_type<tc>, window_params = [{transform_indices = @transform_0, window_bounds = array<i64: 1, 8, 32>}, {pipeline_mode = #tpu.pipeline_mode<synchronous>, transform_indices = @transform_1, window_bounds = array<i64: 32, 128>}, {pipeline_mode = #tpu.pipeline_mode<synchronous>, transform_indices = @transform_2, window_bounds = array<i64: 1, 128>}, {pipeline_mode = #tpu.pipeline_mode<synchronous>, transform_indices = @transform_3, window_bounds = array<i64: 128, 32>}, {pipeline_mode = #tpu.pipeline_mode<synchronous>, transform_indices = @transform_4, window_bounds = array<i64: 1, 32>}, {pipeline_mode = #tpu.pipeline_mode<synchronous>, transform_indices = @transform_5, window_bounds = array<i64: 1, 32>}, {pipeline_mode = #tpu.pipeline_mode<synchronous>, transform_indices = @transform_6, window_bounds = array<i64: 1, 32>}, {transform_indices = @transform_7, window_bounds = array<i64: 1, 8, 32>}]} {
    %c0 = arith.constant 0 : index
    %c0_0 = arith.constant 0 : index
    %c0_1 = arith.constant 0 : index
    %0 = vector.load %arg2[%c0, %c0_0, %c0_1] : memref<1x8x32xf32, #tpu.memory_space<vmem>>, vector<1x8x32xf32>
    %1 = vector.shape_cast %0 : vector<1x8x32xf32> to vector<8x32xf32>
    %c0_2 = arith.constant 0 : index
    %c0_3 = arith.constant 0 : index
    %2 = vector.load %arg3[%c0_2, %c0_3] : memref<32x128xf32, #tpu.memory_space<vmem>>, vector<32x128xf32>
    %cst = arith.constant dense<0.000000e+00> : vector<8x128xf32>
    %3 = tpu.matmul %1, %2, %cst {dimension_numbers = #tpu.dot_dimension_numbers<[1], [0], [0], [1], [0, 0, 1, 1], [], []>} : vector<8x32xf32>, vector<32x128xf32>, vector<8x128xf32> -> vector<8x128xf32>
    %c0_4 = arith.constant 0 : index
    %c0_5 = arith.constant 0 : index
    %4 = vector.load %arg4[%c0_4, %c0_5] : memref<1x128xf32, #tpu.memory_space<vmem>>, vector<1x128xf32>
    %5 = vector.broadcast %4 : vector<1x128xf32> to vector<8x128xf32>
    %6 = arith.addf %3, %5 : vector<8x128xf32>
    %7 = arith.mulf %6, %6 : vector<8x128xf32>
    %8 = arith.mulf %6, %7 : vector<8x128xf32>
    %cst_6 = arith.constant 4.471500e-02 : f32
    %9 = vector.broadcast %cst_6 : f32 to vector<8x128xf32>
    %10 = arith.mulf %9, %8 : vector<8x128xf32>
    %11 = arith.addf %6, %10 : vector<8x128xf32>
    %cst_7 = arith.constant 0.797884583 : f32
    %12 = vector.broadcast %cst_7 : f32 to vector<8x128xf32>
    %13 = arith.mulf %12, %11 : vector<8x128xf32>
    %14 = math.tanh %13 : vector<8x128xf32>
    %cst_8 = arith.constant 1.000000e+00 : f32
    %15 = vector.broadcast %cst_8 : f32 to vector<8x128xf32>
    %16 = arith.addf %15, %14 : vector<8x128xf32>
    %cst_9 = arith.constant 5.000000e-01 : f32
    %17 = vector.broadcast %cst_9 : f32 to vector<8x128xf32>
    %18 = arith.mulf %17, %16 : vector<8x128xf32>
    %19 = arith.mulf %6, %18 : vector<8x128xf32>
    %c0_10 = arith.constant 0 : index
    %c0_11 = arith.constant 0 : index
    %20 = vector.load %arg5[%c0_10, %c0_11] : memref<128x32xf32, #tpu.memory_space<vmem>>, vector<128x32xf32>
    %cst_12 = arith.constant dense<0.000000e+00> : vector<8x32xf32>
    %21 = tpu.matmul %19, %20, %cst_12 {dimension_numbers = #tpu.dot_dimension_numbers<[1], [0], [0], [1], [0, 0, 1, 1], [], []>} : vector<8x128xf32>, vector<128x32xf32>, vector<8x32xf32> -> vector<8x32xf32>
    %c0_13 = arith.constant 0 : index
    %c0_14 = arith.constant 0 : index
    %22 = vector.load %arg6[%c0_13, %c0_14] : memref<1x32xf32, #tpu.memory_space<vmem>>, vector<1x32xf32>
    %23 = vector.broadcast %22 : vector<1x32xf32> to vector<8x32xf32>
    %24 = arith.addf %21, %23 : vector<8x32xf32>
    %25 = arith.addf %24, %1 : vector<8x32xf32>
    %cst_15 = arith.constant dense<0.000000e+00> : vector<8xf32>
    %26 = vector.multi_reduction <add>, %25, %cst_15 [1] : vector<8x32xf32> to vector<8xf32>
    %27 = vector.shape_cast %26 : vector<8xf32> to vector<8x1xf32>
    %cst_16 = arith.constant 3.200000e+01 : f32
    %28 = vector.broadcast %cst_16 : f32 to vector<8x1xf32>
    %29 = arith.divf %27, %28 : vector<8x1xf32>
    %30 = vector.broadcast %29 : vector<8x1xf32> to vector<8x32xf32>
    %31 = arith.subf %25, %30 : vector<8x32xf32>
    %32 = arith.mulf %31, %31 : vector<8x32xf32>
    %cst_17 = arith.constant dense<0.000000e+00> : vector<8xf32>
    %33 = vector.multi_reduction <add>, %32, %cst_17 [1] : vector<8x32xf32> to vector<8xf32>
    %34 = vector.shape_cast %33 : vector<8xf32> to vector<8x1xf32>
    %cst_18 = arith.constant 3.200000e+01 : f32
    %35 = vector.broadcast %cst_18 : f32 to vector<8x1xf32>
    %36 = arith.divf %34, %35 : vector<8x1xf32>
    %cst_19 = arith.constant 9.99999996E-13 : f32
    %37 = vector.broadcast %cst_19 : f32 to vector<8x1xf32>
    %38 = arith.addf %36, %37 : vector<8x1xf32>
    %39 = math.rsqrt %38 : vector<8x1xf32>
    %40 = vector.broadcast %39 : vector<8x1xf32> to vector<8x32xf32>
    %41 = arith.mulf %31, %40 : vector<8x32xf32>
    %c0_20 = arith.constant 0 : index
    %c0_21 = arith.constant 0 : index
    %42 = vector.load %arg7[%c0_20, %c0_21] : memref<1x32xf32, #tpu.memory_space<vmem>>, vector<1x32xf32>
    %43 = vector.broadcast %42 : vector<1x32xf32> to vector<8x32xf32>
    %44 = arith.mulf %41, %43 : vector<8x32xf32>
    %c0_22 = arith.constant 0 : index
    %c0_23 = arith.constant 0 : index
    %45 = vector.load %arg8[%c0_22, %c0_23] : memref<1x32xf32, #tpu.memory_space<vmem>>, vector<1x32xf32>
    %46 = vector.broadcast %45 : vector<1x32xf32> to vector<8x32xf32>
    %47 = arith.addf %44, %46 : vector<8x32xf32>
    %c0_24 = arith.constant 0 : index
    %c0_25 = arith.constant 0 : index
    %c0_26 = arith.constant 0 : index
    %48 = vector.load %arg9[%c0_24, %c0_25, %c0_26] : memref<1x8x32xf32, #tpu.memory_space<vmem>>, vector<1x8x32xf32>
    %49 = vector.shape_cast %48 : vector<1x8x32xf32> to vector<8x32xf32>
    %50 = vector.shape_cast %47 : vector<8x32xf32> to vector<1x8x32xf32>
    tpu.vector_store %arg9[%c0_24, %c0_25, %c0_26], %50 {strides = array<i32>} : memref<1x8x32xf32, #tpu.memory_space<vmem>>, vector<1x8x32xf32>,
    return
  }
  func.func @transform_0(%arg0: i32, %arg1: i32) -> (i32, i32, i32) {
    %c0_i32 = arith.constant 0 : i32
    %c0_i32_0 = arith.constant 0 : i32
    return %arg0, %arg1, %c0_i32 : i32, i32, i32
  }
  func.func @transform_1(%arg0: i32, %arg1: i32) -> (i32, i32) {
    %c0_i32 = arith.constant 0 : i32
    %c0_i32_0 = arith.constant 0 : i32
    %c0_i32_1 = arith.constant 0 : i32
    return %c0_i32, %c0_i32_0 : i32, i32
  }
  func.func @transform_2(%arg0: i32, %arg1: i32) -> (i32, i32) {
    %c0_i32 = arith.constant 0 : i32
    %c0_i32_0 = arith.constant 0 : i32
    %c0_i32_1 = arith.constant 0 : i32
    return %c0_i32, %c0_i32_0 : i32, i32
  }
  func.func @transform_3(%arg0: i32, %arg1: i32) -> (i32, i32) {
    %c0_i32 = arith.constant 0 : i32
    %c0_i32_0 = arith.constant 0 : i32
    %c0_i32_1 = arith.constant 0 : i32
    return %c0_i32, %c0_i32_0 : i32, i32
  }
  func.func @transform_4(%arg0: i32, %arg1: i32) -> (i32, i32) {
    %c0_i32 = arith.constant 0 : i32
    %c0_i32_0 = arith.constant 0 : i32
    %c0_i32_1 = arith.constant 0 : i32
    return %c0_i32, %c0_i32_0 : i32, i32
  }
  func.func @transform_5(%arg0: i32, %arg1: i32) -> (i32, i32) {
    %c0_i32 = arith.constant 0 : i32
    %c0_i32_0 = arith.constant 0 : i32
    %c0_i32_1 = arith.constant 0 : i32
    return %c0_i32, %c0_i32_0 : i32, i32
  }
  func.func @transform_6(%arg0: i32, %arg1: i32) -> (i32, i32) {
    %c0_i32 = arith.constant 0 : i32
    %c0_i32_0 = arith.constant 0 : i32
    %c0_i32_1 = arith.constant 0 : i32
    return %c0_i32, %c0_i32_0 : i32, i32
  }
  func.func @transform_7(%arg0: i32, %arg1: i32) -> (i32, i32, i32) {
    %c0_i32 = arith.constant 0 : i32
    %c0_i32_0 = arith.constant 0 : i32
    return %arg0, %arg1, %c0_i32 : i32, i32, i32
  }
}

</mosaic_0001>

<bundles_post_ra>
// kernel: bert_encoder_forward.5
= control target key start
LH: loop header
LB: loop body
LE: loop exit
PB: predicated region body
PF: predicated region fallthrough
CT: control target
= control target key end

     0   :  { %s809_s24 = smov 0   ;;  %s811_s25 = smov 0   ;;  %s925_s0 = inlined_call_operand.vmem [shape: f32[2,8,32], index: 0, kind: input, shape index: {}]   ;;  %s926_s1 = inlined_call_operand.vmem [shape: f32[32,128], index: 1, kind: input, shape index: {}]   ;;  %s927_s2 = inlined_call_operand.vmem [shape: f32[1,128], index: 2, kind: input, shape index: {}]   ;;  %s928_s3 = inlined_call_operand.vmem [shape: f32[128,32], index: 3, kind: input, shape index: {}]   ;;  %s929_s4 = inlined_call_operand.vmem [shape: f32[1,32], index: 4, kind: input, shape index: {}]   ;;  %s930_s5 = inlined_call_operand.vmem [shape: f32[1,32], index: 5, kind: input, shape index: {}]   ;;  %s931_s6 = inlined_call_operand.vmem [shape: f32[1,32], index: 6, kind: input, shape index: {}]   ;;  %s932_s7 = inlined_call_operand.vmem [shape: f32[2,8,32], index: 7, kind: output, shape index: {}]  }
   0x1   :  { %s813_s26 = smov 0  }
   0x2 LB: > { %s29_s27 = sadd.s32 1, %s760_s25  ;;  %p603_p0 = scmp.ge.s32.totalorder %s764_s26, 1  ;;  %s764_s26 = sphi %s813_s26, %s17_s26   ;;  %s760_s25 = sphi %s811_s25, %s934_s25   ;;  %s756_s24 = sphi %s809_s24, %s933_s24  }
   0x3   : > { %p31_p1 = scmp.ge.s32.totalorder %s29_s27, 2  ;;  %p255_p2 = scmp.lt.s32.totalorder %s764_s26, 3 }
   0x5   : > { %s936_s27 = smov (%p31_p1, %s29_s27), 0  ;;  %p256_p3 = pnand %p603_p0, %p255_p2 }
   0x6   : > { %v306_v0 = vld [vmem:[%s926_s1] sm:$0xff] (!%p256_p3)  ;;  %v307_v1 = vld [vmem:[%s926_s1 + $0x8] sm:$0xff] (!%p256_p3)  ;;  %v308_v2 = vld [vmem:[%s926_s1 + $0x10] sm:$0xff] (!%p256_p3)  ;;  %v766_v3 = vmov (!%p256_p3), 0.0|0.0   ;;  %vm767_vm0 = vmmov (!%p256_p3), 0   ;;  %v768_v6 = vmov (!%p256_p3), 0.0  }
   0x7   : > { %259 = sbr.rel (%p256_p3) target bundleno = 789 (0x315), region = 48  ;;  %681 = vmatprep.subr.bf16.mxu0 (!%p256_p3), %v766_v3  ;;  %v682_v4 = vpack.c.bf16 (!%p256_p3), %v307_v1, %v306_v0  ;;  %v309_v5 = vld [vmem:[%s926_s1 + $0x18] sm:$0xff] (!%p256_p3)  ;;  %643 = vmatprep.mubr.msk.f32.mxu0 (!%p256_p3), %vm767_vm0, %v768_v6  ;;  %p291_p4 = scmp.lt.s32.totalorder (!%p256_p3), %s756_s24, 1  ;;  %v400_v7 = vld [vmem:[%s928_s3] sm:$0xff] (!%p256_p3)  ;;  %v401_v8 = vld [vmem:[%s928_s3 + $0x8] sm:$0xff] (!%p256_p3)  ;;  %vm317_vm1 = vcmask (!%p256_p3), 261120  }
   0x8   : > { %687 = vmatprep.subr.bf16.mxu1 (!%p256_p3), %v766_v3  ;;  %v688_v9 = vpack.c.bf16 (!%p256_p3), %v401_v8, %v400_v7  ;;  %678 = vmatprep.mubr.msk.f32.mxu1 (!%p256_p3), %vm767_vm0, %v768_v6  ;;  %v685_v10 = vpack.c.bf16 (!%p256_p3), %v309_v5, %v308_v2  ;;  %v402_v12 = vld [vmem:[%s928_s3 + $0x10] sm:$0xff] (!%p256_p3)  ;;  %v403_v13 = vld [vmem:[%s928_s3 + $0x18] sm:$0xff] (!%p256_p3)  ;;  %v404_v15 = vld [vmem:[%s928_s3 + $0x20] sm:$0xff] (!%p256_p3) }
   0x9   : > { %683 = vmatpush3.bf16.msra.mxu0 (!%p256_p3), %v682_v4  ;;  %v691_v14 = vpack.c.bf16 (!%p256_p3), %v403_v13, %v402_v12  ;;  %v405_v16 = vld [vmem:[%s928_s3 + $0x28] sm:$0xff] (!%p256_p3)  ;;  %v406_v18 = vld [vmem:[%s928_s3 + $0x30] sm:$0xff] (!%p256_p3)  ;;  %v407_v19 = vld [vmem:[%s928_s3 + $0x38] sm:$0xff] (!%p256_p3) }
   0xa   : > { %684 = vmatprep.subr.bf16.mxu0 (!%p256_p3), %v766_v3  ;;  %689 = vmatpush3.bf16.msra.mxu1 (!%p256_p3), %v688_v9  ;;  %v694_v17 = vpack.c.bf16 (!%p256_p3), %v405_v16, %v404_v15  ;;  %v697_v20 = vpack.c.bf16 (!%p256_p3), %v407_v19, %v406_v18  ;;  %v408_v21 = vld [vmem:[%s928_s3 + $0x40] sm:$0xff] (!%p256_p3)  ;;  %v409_v22 = vld [vmem:[%s928_s3 + $0x48] sm:$0xff] (!%p256_p3)  ;;  %v410_v24 = vld [vmem:[%s928_s3 + $0x50] sm:$0xff] (!%p256_p3) }
   0xb   : > { %690 = vmatprep.subr.bf16.mxu1 (!%p256_p3), %v766_v3  ;;  %v700_v23 = vpack.c.bf16 (!%p256_p3), %v409_v22, %v408_v21  ;;  %v411_v25 = vld [vmem:[%s928_s3 + $0x58] sm:$0xff] (!%p256_p3)  ;;  %v412_v27 = vld [vmem:[%s928_s3 + $0x60] sm:$0xff] (!%p256_p3)  ;;  %v413_v28 = vld [vmem:[%s928_s3 + $0x68] sm:$0xff] (!%p256_p3) }
   0xc   : > { %v703_v26 = vpack.c.bf16 (!%p256_p3), %v411_v25, %v410_v24  ;;  %v706_v29 = vpack.c.bf16 (!%p256_p3), %v413_v28, %v412_v27  ;;  %v414_v30 = vld [vmem:[%s928_s3 + $0x70] sm:$0xff] (!%p256_p3)  ;;  %v415_v31 = vld [vmem:[%s928_s3 + $0x78] sm:$0xff] (!%p256_p3)  ;;  %v606_v33 = vld [vmem:[%s927_s2] ss:$0 sm:$0xff] (!%p256_p3) }
   0xd   : > { %686 = vmatpush3.bf16.msra.mxu0 (!%p256_p3), %v685_v10  ;;  %v709_v32 = vpack.c.bf16 (!%p256_p3), %v415_v31, %v414_v30  ;;  %v608_v46 = vld [vmem:[%s929_s4] ss:$0 sm:$0xff] (!%p256_p3) }
   0xe   : > { %s938_s24 = smov (!%p291_p4, %s756_s24), 1  ;;  %692 = vmatpush3.bf16.msra.mxu1 %v691_v14  ;;  %v609_v61 = vld [vmem:[%s930_s5] ss:$0 sm:$0xff] }
   0xf   : > { %s604_s17 = sshll.u32 %s938_s24, 3  ;;  %693 = vmatprep.subr.bf16.mxu1 %v766_v3  ;;  %v610_v63 = vld [vmem:[%s931_s6] ss:$0 sm:$0xff] }
  0x10   : > { %s297_s20 = scalar_lea.vmem %s925_s0, %s604_s17  ;;  %s304_s23 = scalar_lea.vmem %s932_s7, %s604_s17 }
  0x11   : > { %v305_v11 = vld [vmem:[%s297_s20] sm:$0xff] }
  0x12   : > { %644 = vmatmul.mubr.msk.f32.vlgmr.msra.gmra.mrb[0].mxu0 %vm317_vm1, %v305_v11  ;;  %695 = vmatpush3.bf16.msra.mxu1 %v694_v17 }
  0x13   : > { %696 = vmatprep.subr.bf16.mxu1 %v766_v3 }
  0x16   : > { %698 = vmatpush3.bf16.msra.mxu1 %v697_v20 }
  0x17   : > { %699 = vmatprep.subr.bf16.mxu1 %v766_v3 }
  0x1a   : > { %701 = vmatpush3.bf16.msra.mxu1 %v700_v23 }
  0x1b   : > { %702 = vmatprep.subr.bf16.mxu1 %v766_v3 }
  0x1e   : > { %704 = vmatpush3.bf16.msra.mxu1 %v703_v26 }
  0x1f   : > { %705 = vmatprep.subr.bf16.mxu1 %v766_v3 }
  0x22   : > { %707 = vmatpush3.bf16.msra.mxu1 %v706_v29 }
  0x23   : > { %708 = vmatprep.subr.bf16.mxu1 %v766_v3 }
  0x26   : > { %710 = vmatpush3.bf16.msra.mxu1 %v709_v32 }
  0xe5   : > { %v387_v34 = vpop.f32.mrb[0].mxu0 }
  0xe6   : > { %v388_v35 = vadd.f32 %v606_v33, %v387_v34  ;;  %v645_v36 = vpop.f32.mrb[1].mxu0 }
  0xe8   : > { %v391_v37 = vmul.f32 %v388_v35, %v388_v35 }
  0xea   : > { %v392_v38 = vmul.f32 %v391_v37, %v388_v35 }
  0xec   : > { %v393_v39 = vmul.f32 0.044715, %v392_v38 }
  0xee   : > { %v394_v40 = vadd.f32 %v393_v39, %v388_v35 }
  0xf0   : > { %v395_v41 = vmul.f32 0.7978846, %v394_v40 }
  0xf2   : > { %738 = vtanh.f32 %v395_v41 }
  0xfc   : > { %v739_v42 = vpop.eup %738 }
  0xfd   : > { %v397_v43 = vadd.f32 1.0, %v739_v42 }
  0xff   : > { %v398_v44 = vmul.f32 0.5, %v397_v43 }
 0x101   : > { %v399_v45 = vmul.f32 %v398_v44, %v388_v35 }
 0x103   : > { %679 = vmatmul.mubr.f32.vlgmr.msra.gmra.mrb[0].mxu1 %v399_v45 }
 0x1d6   : > { %v489_v47 = vpop.f32.mrb[0].mxu1 }
 0x1d7   : > { %v490_v48 = vadd.f32 %v608_v46, %v489_v47  ;;  %v680_v49 = vpop.f32.mrb[1].mxu1 }
 0x1d9   : > { %v493_v50 = vadd.f32 %v490_v48, %v305_v11 }
 0x1db   : > { %v494_v51 = vsel %vm317_vm1, %v493_v50, 0.0 }
 0x1dc   : > { %495 = vadd.xlane.f32.xlu0 %v494_v51 }
 0x269   : > { %v496_v52 = vpop.xlane.xlu0 %495 }
 0x26a   : > { %v498_v53 = vmul.f32 0.03125, %v496_v52 }
 0x26c   : > { %v499_v54 = vsub.f32 %v493_v50, %v498_v53 }
 0x26e   : > { %v500_v55 = vmul.f32 %v499_v54, %v499_v54 }
 0x270   : > { %v501_v56 = vsel %vm317_vm1, %v500_v55, 0.0 }
 0x271   : > { %502 = vadd.xlane.f32.xlu0 %v501_v56 }
 0x2fe   : > { %v503_v57 = vpop.xlane.xlu0 %502 }
 0x2ff   : > { %v504_v58 = vmul.f32 0.03125, %v503_v57 }
 0x301   : > { %v505_v59 = vadd.f32 1e-12, %v504_v58 }
 0x303   : > { %740 = vrsqrt.f32 %v505_v59 }
 0x30d   : > { %v741_v60 = vpop.eup %740 }
 0x30e   : > { %v507_v62 = vmul.f32 %v741_v60, %v499_v54 }
 0x310   : > { %v515_v0 = vmul.f32 %v609_v61, %v507_v62 }
 0x312   : > { %v523_v1 = vadd.f32 %v610_v63, %v515_v0 }
 0x314   : > { %524 = vst.msk [vmem:[%s304_s23] sm:$0xff] %vm317_vm1, %v523_v1 }
 0x315 PF: > { %s17_s26 = sadd.s32 1, %s764_s26   ;;  %s933_s24 = smov %s760_s25 }
 0x316   : > { %p14_p5 = scmp.ge.s32.totalorder %s17_s26, 4   ;;  %s934_s25 = smov %s936_s27 }
 0x318   :  { %16 = sbr.rel (!%p14_p5) target bundleno = 2 (0x2), region = 78 }

// kernel: bert_encoder_forward.7
= control target key start
LH: loop header
LB: loop body
LE: loop exit
PB: predicated region body
PF: predicated region fallthrough
CT: control target
= control target key end

     0   :  { %12 = vsyncpa [#allocation3], 0  ;;  %s1093_s0 = inlined_call_operand.vmem [shape: f32[2,8,32], index: 0, kind: input, shape index: {}]   ;;  %s1094_s1 = inlined_call_operand.vmem [shape: f32[32,128], index: 1, kind: input, shape index: {}]   ;;  %s1095_s2 = inlined_call_operand.vmem [shape: f32[1,128], index: 2, kind: input, shape index: {}]   ;;  %s1096_s3 = inlined_call_operand.vmem [shape: f32[128,32], index: 3, kind: input, shape index: {}]   ;;  %s1097_s4 = inlined_call_operand.vmem [shape: f32[1,32], index: 4, kind: input, shape index: {}]   ;;  %s1098_s5 = inlined_call_operand.vmem [shape: f32[1,32], index: 5, kind: input, shape index: {}]   ;;  %s1099_s6 = inlined_call_operand.vmem [shape: f32[1,32], index: 6, kind: input, shape index: {}]   ;;  %s1100_s7 = inlined_call_operand.hbm [shape: f32[2,8,32], index: 7, kind: output, shape index: {}]  }
   0x1   :  { %14 = vsyncpa [#allocation3 + $0x1], 0  ;;  %s905_s24 = smov 0   ;;  %s907_s25 = smov 0  }
   0x2   :  { %s909_s26 = smov 0   ;;  %s911_s27 = smov 0  }
   0x3   :  { %s913_s28 = smov 0   ;;  %s915_s29 = smov 0  }
   0x4 LB: > { %s605_s30 = sadd.s32 4294967295, %s859_s29   ;;  %s606_s8 = sadd.s32 4294967294, %s859_s29   ;;  %s859_s29 = sphi %s915_s29, %s20_s29   ;;  %s855_s28 = sphi %s913_s28, %s1107_s28   ;;  %s851_s27 = sphi %s911_s27, %s1106_s27   ;;  %s847_s26 = sphi %s909_s26, %s1105_s26   ;;  %s843_s25 = sphi %s907_s25, %s1104_s25   ;;  %s839_s24 = sphi %s905_s24, %s1103_s24  }
   0x5   : > { %s32_s9 = sadd.s32 1, %s855_s28  ;;  %s195_s10 = sadd.s32 1, %s847_s26 }
   0x6   : > { %p34_p0 = scmp.ge.s32.totalorder %s32_s9, 2  ;;  %p205_p1 = scmp.ne.s32.totalorder %s847_s26, %s843_s25 }
   0x7   : > { %p206_p2 = scmp.eq.s32.totalorder %s605_s30, 1  ;;  %p211_p3 = scmp.ne.s32.totalorder %s843_s25, %s839_s24 }
   0x8   : > { %s1109_s9 = smov (%p34_p0, %s32_s9), 0  ;;  %p212_p5 = scmp.eq.s32.totalorder %s606_s8, 1 }
   0x9   : > { %p945_p4 = por %p206_p2, %p205_p1  ;;  %s190_s12 = ssub.s32 %s855_s28, %s1109_s9 }
   0xa   : > { %p609_p6 = scmp.ge.s32.totalorder %s859_s29, 1  ;;  %p193_p7 = scmp.eq.s32.totalorder %s190_s12, 0 }
   0xb   : > { %p952_p8 = por %p212_p5, %p211_p3  ;;  %p258_p9 = scmp.lt.s32.totalorder %s859_s29, 3 }
   0xc   : > { %s958_s14 = scalar_select %p193_p7, %s847_s26, %s195_s10  }
   0xd   : > { %p259_p10 = pnand %p609_p6, %p258_p9 }
   0xe   : > { %v300_v0 = vld [vmem:[%s1094_s1] sm:$0xff] (!%p259_p10)  ;;  %v301_v1 = vld [vmem:[%s1094_s1 + $0x8] sm:$0xff] (!%p259_p10)  ;;  %v302_v2 = vld [vmem:[%s1094_s1 + $0x10] sm:$0xff] (!%p259_p10)  ;;  %v861_v3 = vmov (!%p259_p10), 0.0|0.0   ;;  %vm862_vm0 = vmmov (!%p259_p10), 0   ;;  %v863_v6 = vmov (!%p259_p10), 0.0  }
   0xf   : > { %262 = sbr.rel (%p259_p10) target bundleno = 811 (0x32b), region = 48  ;;  %689 = vmatprep.subr.bf16.mxu0 (!%p259_p10), %v861_v3  ;;  %v690_v4 = vpack.c.bf16 (!%p259_p10), %v301_v1, %v300_v0  ;;  %v303_v5 = vld [vmem:[%s1094_s1 + $0x18] sm:$0xff] (!%p259_p10)  ;;  %651 = vmatprep.mubr.msk.f32.mxu0 (!%p259_p10), %vm862_vm0, %v863_v6  ;;  %p292_p11 = scmp.lt.s32.totalorder (!%p259_p10), %s851_s27, 1  ;;  %v394_v7 = vld [vmem:[%s1096_s3] sm:$0xff] (!%p259_p10)  ;;  %v395_v8 = vld [vmem:[%s1096_s3 + $0x8] sm:$0xff] (!%p259_p10)  ;;  %vm311_vm1 = vcmask (!%p259_p10), 261120  }
  0x10   : > { %695 = vmatprep.subr.bf16.mxu1 (!%p259_p10), %v861_v3  ;;  %v696_v9 = vpack.c.bf16 (!%p259_p10), %v395_v8, %v394_v7  ;;  %686 = vmatprep.mubr.msk.f32.mxu1 (!%p259_p10), %vm862_vm0, %v863_v6  ;;  %v693_v10 = vpack.c.bf16 (!%p259_p10), %v303_v5, %v302_v2  ;;  %v396_v12 = vld [vmem:[%s1096_s3 + $0x10] sm:$0xff] (!%p259_p10)  ;;  %v397_v13 = vld [vmem:[%s1096_s3 + $0x18] sm:$0xff] (!%p259_p10)  ;;  %v398_v15 = vld [vmem:[%s1096_s3 + $0x20] sm:$0xff] (!%p259_p10)  ;;  %s289_s8 = sand.u32 (!%p259_p10), 1, %s843_s25  }
  0x11   : > { %691 = vmatpush3.bf16.msra.mxu0 (!%p259_p10), %v690_v4  ;;  %v699_v14 = vpack.c.bf16 (!%p259_p10), %v397_v13, %v396_v12  ;;  %v399_v16 = vld [vmem:[%s1096_s3 + $0x28] sm:$0xff] (!%p259_p10)  ;;  %v400_v18 = vld [vmem:[%s1096_s3 + $0x30] sm:$0xff] (!%p259_p10)  ;;  %v401_v19 = vld [vmem:[%s1096_s3 + $0x38] sm:$0xff] (!%p259_p10)  ;;  %s610_s10 = sshll.u32 (!%p259_p10), %s289_s8, 3  ;;  %s520_s30 = scalar_lea.sflag (!%p259_p10), [#allocation3], %s289_s8 }
  0x12   : > { %692 = vmatprep.subr.bf16.mxu0 (!%p259_p10), %v861_v3  ;;  %697 = vmatpush3.bf16.msra.mxu1 (!%p259_p10), %v696_v9  ;;  %v702_v17 = vpack.c.bf16 (!%p259_p10), %v399_v16, %v398_v15  ;;  %v705_v20 = vpack.c.bf16 (!%p259_p10), %v401_v19, %v400_v18  ;;  %v402_v21 = vld [vmem:[%s1096_s3 + $0x40] sm:$0xff] (!%p259_p10)  ;;  %v403_v22 = vld [vmem:[%s1096_s3 + $0x48] sm:$0xff] (!%p259_p10)  ;;  %v404_v24 = vld [vmem:[%s1096_s3 + $0x50] sm:$0xff] (!%p259_p10)  ;;  %s291_s19 = scalar_lea.vmem (!%p259_p10), [#allocation2], %s610_s10 }
  0x13   : > { %698 = vmatprep.subr.bf16.mxu1 (!%p259_p10), %v861_v3  ;;  %v708_v23 = vpack.c.bf16 (!%p259_p10), %v403_v22, %v402_v21  ;;  %v405_v25 = vld [vmem:[%s1096_s3 + $0x58] sm:$0xff] (!%p259_p10)  ;;  %v406_v27 = vld [vmem:[%s1096_s3 + $0x60] sm:$0xff] (!%p259_p10)  ;;  %v407_v28 = vld [vmem:[%s1096_s3 + $0x68] sm:$0xff] (!%p259_p10)  ;;  %s534_s20 = sshll.u32 (!%p259_p10), %s291_s19, 4  ;;  %s1047_s20 = int_to_ptr.vmem [resolvable:$true] %s534_s20 }
  0x14   : > { %v711_v26 = vpack.c.bf16 (!%p259_p10), %v405_v25, %v404_v24  ;;  %v714_v29 = vpack.c.bf16 (!%p259_p10), %v407_v28, %v406_v27  ;;  %v408_v30 = vld [vmem:[%s1096_s3 + $0x70] sm:$0xff] (!%p259_p10)  ;;  %v409_v31 = vld [vmem:[%s1096_s3 + $0x78] sm:$0xff] (!%p259_p10)  ;;  %v612_v33 = vld [vmem:[%s1095_s2] ss:$0 sm:$0xff] (!%p259_p10) }
  0x15   : > { %694 = vmatpush3.bf16.msra.mxu0 (!%p259_p10), %v693_v10  ;;  %v717_v32 = vpack.c.bf16 (!%p259_p10), %v409_v31, %v408_v30  ;;  %v614_v46 = vld [vmem:[%s1097_s4] ss:$0 sm:$0xff] (!%p259_p10) }
  0x16   : > { %s293_s12 = scalar_select %p292_p11, %s851_s27, 1  ;;  %700 = vmatpush3.bf16.msra.mxu1 %v699_v14  ;;  %v615_v61 = vld [vmem:[%s1098_s5] ss:$0 sm:$0xff] }
  0x17   : > { %701 = vmatprep.subr.bf16.mxu1 %v861_v3  ;;  %v616_v63 = vld [vmem:[%s1099_s6] ss:$0 sm:$0xff] }
  0x18   : > { %s611_s15 = sshll.u32 %s293_s12, 3  ;;  %s781_s12 = scalar_lea.vmem %s1047_s20, 128 }
  0x19   : > { %s298_s18 = scalar_lea.vmem %s1093_s0, %s611_s15  ;;  %p782_p12 = scmp.ne.s32.totalorder %s1047_s20, %s781_s12 }
  0x1a   : > { %v299_v11 = vld [vmem:[%s298_s18] sm:$0xff]  ;;  %703 = vmatpush3.bf16.msra.mxu1 %v702_v17  ;;  %s618_s18 = sshll.u32 %s851_s27, 7  ;;  %s864_s27 = smov [#allocation2]  }
  0x1b   : > { %652 = vmatmul.mubr.msk.f32.vlgmr.msra.gmra.mrb[0].mxu0 %vm311_vm1, %v299_v11  ;;  %704 = vmatprep.subr.bf16.mxu1 %v861_v3  ;;  %s1045_s23 = scalar_lea.hbm %s1100_s7, %s618_s18  ;;  %p783_p13 = pnand %p782_p12, %p945_p4 }
  0x1c   : > { %s785_s10 = sshll.u32 %s864_s27, 4  ;;  %s786_s10 = int_to_ptr.vmem [resolvable:$false] %s785_s10 }
  0x1d   : > { %p784_p0 = pneg %p783_p13  ;;  %s787_s15 = scalar_lea.vmem %s786_s10, 256 }
  0x1e   : > { %706 = vmatpush3.bf16.msra.mxu1 %v705_v20  ;;  %p788_p1 = scmp.lt.s32.totalorder %s1047_s20, %s786_s10  ;;  %p789_p2 = scmp.lt.s32.totalorder %s787_s15, %s781_s12 }
  0x1f   : > { %707 = vmatprep.subr.bf16.mxu1 %v861_v3 }
  0x20   : > { %p790_p3 = por %p789_p2, %p788_p1 }
  0x22   : > { %709 = vmatpush3.bf16.msra.mxu1 %v708_v23  ;;  %p791_p5 = pnand %p790_p3, %p784_p0 }
  0x23   : > { %710 = vmatprep.subr.bf16.mxu1 %v861_v3 }
  0x26   : > { %712 = vmatpush3.bf16.msra.mxu1 %v711_v26 }
  0x27   : > { %713 = vmatprep.subr.bf16.mxu1 %v861_v3 }
  0x2a   : > { %715 = vmatpush3.bf16.msra.mxu1 %v714_v29 }
  0x2b   : > { %716 = vmatprep.subr.bf16.mxu1 %v861_v3 }
  0x2e   : > { %718 = vmatpush3.bf16.msra.mxu1 %v717_v32 }
  0xee   : > { %v381_v34 = vpop.f32.mrb[0].mxu0 }
  0xef   : > { %v382_v35 = vadd.f32 %v612_v33, %v381_v34  ;;  %v653_v36 = vpop.f32.mrb[1].mxu0 }
  0xf1   : > { %v385_v37 = vmul.f32 %v382_v35, %v382_v35 }
  0xf3   : > { %v386_v38 = vmul.f32 %v385_v37, %v382_v35 }
  0xf5   : > { %v387_v39 = vmul.f32 0.044715, %v386_v38 }
  0xf7   : > { %v388_v40 = vadd.f32 %v387_v39, %v382_v35 }
  0xf9   : > { %v389_v41 = vmul.f32 0.7978846, %v388_v40 }
  0xfb   : > { %777 = vtanh.f32 %v389_v41 }
 0x105   : > { %v778_v42 = vpop.eup %777 }
 0x106   : > { %v391_v43 = vadd.f32 1.0, %v778_v42 }
 0x108   : > { %v392_v44 = vmul.f32 0.5, %v391_v43 }
 0x10a   : > { %v393_v45 = vmul.f32 %v392_v44, %v382_v35 }
 0x10c   : > { %687 = vmatmul.mubr.f32.vlgmr.msra.gmra.mrb[0].mxu1 %v393_v45 }
 0x1df   : > { %v483_v47 = vpop.f32.mrb[0].mxu1 }
 0x1e0   : > { %v484_v48 = vadd.f32 %v614_v46, %v483_v47  ;;  %v688_v49 = vpop.f32.mrb[1].mxu1 }
 0x1e2   : > { %v487_v50 = vadd.f32 %v484_v48, %v299_v11 }
 0x1e4   : > { %v488_v51 = vsel %vm311_vm1, %v487_v50, 0.0 }
 0x1e5   : > { %489 = vadd.xlane.f32.xlu0 %v488_v51 }
 0x272   : > { %v490_v52 = vpop.xlane.xlu0 %489 }
 0x273   : > { %v492_v53 = vmul.f32 0.03125, %v490_v52 }
 0x275   : > { %v493_v54 = vsub.f32 %v487_v50, %v492_v53 }
 0x277   : > { %v494_v55 = vmul.f32 %v493_v54, %v493_v54 }
 0x279   : > { %v495_v56 = vsel %vm311_vm1, %v494_v55, 0.0 }
 0x27a   : > { %496 = vadd.xlane.f32.xlu0 %v495_v56 }
 0x307   : > { %v497_v57 = vpop.xlane.xlu0 %496 }
 0x308   : > { %v498_v58 = vmul.f32 0.03125, %v497_v57 }
 0x30a   : > { %v499_v59 = vadd.f32 1e-12, %v498_v58 }
 0x30c   : > { %779 = vrsqrt.f32 %v499_v59 }
 0x316   : > { %v780_v60 = vpop.eup %779 }
 0x317   : > { %v501_v62 = vmul.f32 %v780_v60, %v493_v54 }
 0x319   : > { %v509_v0 = vmul.f32 %v615_v61, %v501_v62 }
 0x31b   : > { %v517_v1 = vadd.f32 %v616_v63, %v509_v0 }
 0x31d   : > { %518 = vst.msk [vmem:[%s291_s19] sm:$0xff] %vm311_vm1, %v517_v1 }
 0x31e   : > { %794 = shalt.err (!%p791_p5)
}
 0x31f   : > { %s795_s8 = scalar_lea.hbm %s1045_s23, 128  ;;  %s799_s18 = scalar_lea.hbm %s1100_s7, 256 }
 0x320   : > { %p796_p6 = scmp.ne.s32.totalorder %s1045_s23, %s795_s8  ;;  %p800_p10 = scmp.lt.u32.totalorder %s1045_s23, %s1100_s7 }
 0x321   : > { %p801_p11 = scmp.lt.u32.totalorder %s799_s18, %s795_s8  ;;  %p803_p13 = scmp.lt.u32.totalorder %s795_s8, %s1045_s23 }
 0x322   : > { %p797_p7 = pnand %p796_p6, %p945_p4 }
 0x323   : > { %p802_p12 = por %p801_p11, %p800_p10 }
 0x324   : > { %p798_p9 = pneg %p797_p7 }
 0x325   : > { %p804_p0 = por %p803_p13, %p802_p12 }
 0x327   : > { %p805_p1 = pnand %p804_p0, %p798_p9 }
 0x329   : > { %808 = shalt.err (!%p805_p1)
}
 0x32a   : > { %719 = dma.vmem_to_hbm [thread:$0]  (%p945_p4), %s1047_s20, 128, %s1045_s23, %s520_s30  }
 0x32b PF: > { %p725_p2 = scmp.ge.s32.totalorder %s859_s29, 2  ;;  %s546_s22 = sand.u32 1, %s839_s24  }
 0x32c   : > { %s547_s12 = scalar_lea.sflag [#allocation3], %s546_s22 }
 0x32d   : > { %p722_p3 = pnand %p725_p2, %p952_p8 }
 0x32f   : > { %834 = dma.done.wait (!%p722_p3), %s547_s12, 128  }
 0x330   : > { %836 = vsyncadd (!%p722_p3), %s547_s12, 4294967168  ;;  %s20_s29 = sadd.s32 1, %s859_s29   ;;  %s1103_s24 = smov %s843_s25 }
 0x331   : > { %p17_p5 = scmp.ge.s32.totalorder %s20_s29, 4   ;;  %s1104_s25 = smov %s847_s26 }
 0x332   : > { %s1105_s26 = smov %s958_s14  ;;  %s1106_s27 = smov %s855_s28 }
 0x333   : > { %s1107_s28 = smov %s1109_s9  ;;  %19 = sbr.rel (!%p17_p5) target bundleno = 4 (0x4), region = 83 }
 0x33a   :  { %552 = vsyncpa [#allocation3], 1 }
 0x33b   :  { %554 = vsyncpa [#allocation3 + $0x1], 1 }

// kernel: bert_encoder_forward.4
= control target key start
LH: loop header
LB: loop body
LE: loop exit
PB: predicated region body
PF: predicated region fallthrough
CT: control target
= control target key end

     0   :  { %13 = vsyncpa [#allocation4], 0  ;;  %s2135_s0 = inlined_call_operand.hbm [shape: f32[2,8,32], index: 0, kind: input, shape index: {}]   ;;  %s2136_s1 = inlined_call_operand.vmem [shape: f32[32,96], index: 1, kind: input, shape index: {}]   ;;  %s2137_s2 = inlined_call_operand.vmem [shape: f32[1,96], index: 2, kind: input, shape index: {}]   ;;  %s2138_s3 = inlined_call_operand.vmem [shape: f32[2,1,8], index: 3, kind: input, shape index: {}]   ;;  %s2139_s4 = inlined_call_operand.hbm [shape: f32[32,32], index: 4, kind: input, shape index: {}]   ;;  %s2140_s5 = inlined_call_operand.vmem [shape: f32[1,32], index: 5, kind: input, shape index: {}]   ;;  %s2141_s6 = inlined_call_operand.vmem [shape: f32[1,32], index: 6, kind: input, shape index: {}]   ;;  %s2142_s7 = inlined_call_operand.vmem [shape: f32[1,32], index: 7, kind: input, shape index: {}]   ;;  %s2143_s8 = inlined_call_operand.vmem [shape: f32[2,8,32], index: 8, kind: output, shape index: {}]  }
   0x1   :  { %15 = vsyncpa [#allocation4 + $0x1], 0 }
   0x2   :  { %16 = vsyncpa [#allocation6], 0  ;;  %s1861_s27 = smov 0   ;;  %s1863_s28 = smov 0  }
   0x3   :  { %s1865_s29 = smov 0   ;;  %s1867_s30 = smov 0  }
   0x4   :  { %s1869_s9 = smov 0   ;;  %s1871_s10 = smov 0  }
   0x5 LB: > { %s1444_s11 = sadd.s32 4294967295, %s1793_s10   ;;  %p54_p0 = scmp.ne.s32.totalorder %s1777_s28, %s1773_s27  ;;  %s1793_s10 = sphi %s1871_s10, %s22_s10   ;;  %s1789_s9 = sphi %s1869_s9, %s2160_s9   ;;  %s1785_s30 = sphi %s1867_s30, %s2159_s30   ;;  %s1781_s29 = sphi %s1865_s29, %s2158_s29   ;;  %s1777_s28 = sphi %s1863_s28, %s2157_s28   ;;  %s1773_s27 = sphi %s1861_s27, %s2156_s27  }
   0x6   : > { %p1891_p1 = scmp.eq.s32.totalorder %s1444_s11, 0  ;;  %p1446_p2 = scmp.ge.s32.totalorder %s1793_s10, 1 }
   0x7   : > { %p258_p3 = scmp.lt.s32.totalorder %s1793_s10, 3  ;;  %s1795_s15 = smov [#allocation5]  }
   0x8   : > { %s2148_s12 = scalar_select %p1891_p1, 1, 0 }
   0x9   : > { %p1899_p4 = por %p1891_p1, %p54_p0  ;;  %p1903_p5 = pnand %p1446_p2, %p258_p3 }
   0xa   : > { %s286_s16 = sshll.u32 %s1795_s15, 4  ;;  %s34_s18 = sadd.s32 1, %s1789_s9  ;;  %s287_s16 = int_to_ptr.vmem [resolvable:$true] %s286_s16 }
   0xb   : > { %s2149_s13 = scalar_select %p1899_p4, 1, 0 }
   0xc   : > { %s2150_s14 = scalar_select %p1903_p5, 1, 0 }
   0xd   : > { %p1584_p6 = pneg %p1903_p5  ;;  %s1681_s21 = scalar_lea.hbm %s2139_s4, 512 }
   0xe   : > { %p1682_p8 = scmp.ne.s32.totalorder %s2139_s4, %s1681_s21  ;;  %p1688_p12 = scmp.lt.u32.totalorder %s1681_s21, %s2139_s4 }
   0xf   : > { %p1911_p7 = pnand %p1584_p6, %p1891_p1 }
  0x11   : > { %p1683_p9 = pneg %p1911_p7 }
  0x13   : > { %p1684_p10 = pnand %p1683_p9, %p1682_p8 }
  0x15   : > { %p1685_p11 = pneg %p1684_p10 }
  0x17   : > { %p1690_p13 = pnand %p1688_p12, %p1685_p11 }
  0x19   : > { %1693 = shalt.err (!%p1690_p13)
}
  0x1a   : > { %s1694_s26 = scalar_lea.vmem %s287_s16, 512  ;;  %p1702_p6 = scmp.lt.s32.totalorder %s287_s16, %s287_s16 }
  0x1b   : > { %p1695_p0 = scmp.ne.s32.totalorder %s287_s16, %s1694_s26  ;;  %p1703_p1 = scmp.lt.s32.totalorder %s1694_s26, %s1694_s26 }
  0x1d   : > { %p1697_p2 = pnand %p1695_p0, %p1683_p9  ;;  %p1704_p4 = por %p1703_p1, %p1702_p6 }
  0x1f   : > { %p1698_p3 = pneg %p1697_p2 }
  0x21   : > { %p1705_p5 = pnand %p1704_p4, %p1698_p3 }
  0x23   : > { %1708 = shalt.err (!%p1705_p5)
}
  0x24   : > { %s1796_s27 = smov 128   ;;  %s1797_s11 = smov 8  }
  0x25   : > { %1587 = dma.hbm_to_vmem [thread:$0]  (!%p1911_p7), %s2139_s4, 512, %s287_s16, [#allocation6], %s1796_s27, %s1796_s27, %s1797_s11  }
  0x26   : > { %p36_p1 = scmp.ge.s32.totalorder %s34_s18, 2  ;;  %s41_s20 = sadd.s32 1, %s1781_s29 }
  0x27   : > { %p48_p4 = scmp.ne.s32.totalorder %s1781_s29, %s1777_s28  ;;  %p49_p5 = scmp.eq.s32.totalorder %s1793_s10, 0 }
  0x28   : > { %s2162_s18 = smov (%p36_p1, %s34_s18), 0  ;;  %p1593_p9 = scmp.lt.s32.totalorder %s1793_s10, 2 }
  0x29   : > { %p50_p8 = por %p49_p5, %p48_p4  ;;  %s38_s21 = ssub.s32 %s1789_s9, %s2162_s18 }
  0x2a   : > { %s309_s22 = sand.u32 1, %s1781_s29   ;;  %p39_p10 = scmp.eq.s32.totalorder %s38_s21, 0 }
  0x2b   : > { %s1451_s23 = sshll.u32 %s309_s22, 3  ;;  %s1452_s24 = sshll.u32 %s1789_s9, 7 }
  0x2c   : > { %s1944_s25 = scalar_select %p39_p10, %s1781_s29, %s41_s20  }
  0x2d   : > { %s1949_s16 = scalar_lea.hbm %s2135_s0, %s1452_s24  ;;  %s313_s27 = scalar_lea.vmem [#allocation3], %s1451_s23 }
  0x2e   : > { %s320_s11 = sshll.u32 %s313_s27, 4  ;;  %p1951_p7 = pnand %p1593_p9, %p50_p8  ;;  %s1955_s11 = int_to_ptr.vmem [resolvable:$true] %s320_s11 }
  0x2f   : > { %s310_s19 = scalar_lea.sflag [#allocation4], %s309_s22  ;;  %s1709_s20 = scalar_lea.hbm %s1949_s16, 128 }
  0x30   : > { %p1710_p11 = scmp.ne.s32.totalorder %s1949_s16, %s1709_s20  ;;  %p1711_p12 = pneg %p1951_p7 }
  0x31   : > { %s1714_s24 = scalar_lea.hbm %s2135_s0, 256  ;;  %p1715_p2 = scmp.lt.u32.totalorder %s1949_s16, %s2135_s0 }
  0x32   : > { %p1712_p13 = pnand %p1711_p12, %p1710_p11  ;;  %p1716_p3 = scmp.lt.u32.totalorder %s1714_s24, %s1709_s20 }
  0x33   : > { %p1718_p1 = scmp.lt.u32.totalorder %s1709_s20, %s1949_s16 }
  0x34   : > { %p1713_p0 = pneg %p1712_p13  ;;  %p1717_p6 = por %p1716_p3, %p1715_p2 }
  0x36   : > { %p1719_p4 = por %p1718_p1, %p1717_p6 }
  0x38   : > { %p1720_p5 = pnand %p1719_p4, %p1713_p0 }
  0x3a   : > { %1723 = shalt.err (!%p1720_p5)
}
  0x3b   : > { %s1724_s22 = scalar_lea.vmem %s1955_s11, 128  ;;  %s1798_s27 = smov [#allocation3]  }
  0x3c   : > { %p1725_p8 = scmp.ne.s32.totalorder %s1955_s11, %s1724_s22  ;;  %s1729_s21 = sshll.u32 %s1798_s27, 4  ;;  %s1730_s21 = int_to_ptr.vmem [resolvable:$false] %s1729_s21 }
  0x3d   : > { %s1731_s23 = scalar_lea.vmem %s1730_s21, 256  ;;  %p1732_p11 = scmp.lt.s32.totalorder %s1955_s11, %s1730_s21 }
  0x3e   : > { %p1727_p9 = pnand %p1725_p8, %p1711_p12  ;;  %p1733_p13 = scmp.lt.s32.totalorder %s1731_s23, %s1724_s22 }
  0x40   : > { %p1728_p10 = pneg %p1727_p9  ;;  %p1734_p2 = por %p1733_p13, %p1732_p11 }
  0x42   : > { %p1735_p3 = pnand %p1734_p2, %p1728_p10 }
  0x44   : > { %1738 = shalt.err (!%p1735_p3)
}
  0x45   : > { %1591 = dma.hbm_to_vmem [thread:$0]  (!%p1951_p7), %s1949_s16, 128, %s1955_s11, %s310_s19  }
  0x46   : > { %p2153_p0 = scmp.ne.s32.totalorder %s2150_s14, 0 }
  0x47   : > { %s337_s20 = sand.u32 (!%p2153_p0), 1, %s1777_s28   ;;  %p2154_p12 = scmp.ne.s32.totalorder (!%p2153_p0), %s2149_s13, 0 }
  0x48   : > { %335 = sbr.rel (%p2153_p0) target bundleno = 2378 (0x94a), region = 52  ;;  %s1454_s24 = sshll.u32 (!%p2153_p0), %s337_s20, 3 }
  0x49   : > { %s338_s17 = scalar_lea.sflag (!%p2153_p0), [#allocation4], %s337_s20  ;;  %s341_s26 = scalar_lea.vmem (!%p2153_p0), [#allocation3], %s1454_s24 }
  0x4f   : > { %1764 = dma.done.wait (%p2154_p12), %s338_s17, 128  }
  0x50   : > { %1766 = vsyncadd (%p2154_p12), %s338_s17, 4294967168  ;;  %p2155_p6 = scmp.ne.s32.totalorder %s2148_s12, 0 }
  0x52   : > { %1768 = dma.done.wait (%p2155_p6), [#allocation6], 512  }
  0x53   : > { %1770 = vsyncadd (%p2155_p6), [#allocation6], 4294966784  ;;  %vm406_vm0 = vcmask 261120   ;;  %v1799_v0 = vmov 0.0|0.0   ;;  %vm1800_vm1 = vmmov 0   ;;  %v1801_v1 = vmov 0.0  }
  0x54   : > { %1566 = vmatprep.subr.bf16.mxu0 %v1799_v0  ;;  %1512 = vmatprep.mubr.msk.f32.mxu0 %vm1800_vm1, %v1801_v1  ;;  %407 = vst.msk [vmem:[#allocation2] sm:$0xff] %vm406_vm0, %v1801_v1  ;;  %v409_v2 = vld [vmem:[%s2136_s1] sm:$0xff]  ;;  %v410_v3 = vld [vmem:[%s2136_s1 + $0x8] sm:$0xff]  ;;  %v411_v4 = vld [vmem:[%s2136_s1 + $0x10] sm:$0xff]  ;;  %s1802_s23 = smov 64   ;;  %s1803_s20 = smov 96  }
  0x55   : > { %1515 = vmatprep.subr.mxu1 %v1801_v1  ;;  %1517 = vmatprep.mubr.msk.f32.mxu1 %vm1800_vm1, %v1801_v1  ;;  %v1567_v5 = vpack.c.bf16 %v410_v3, %v409_v2  ;;  %v412_v6 = vld [vmem:[%s2136_s1 + $0x18] sm:$0xff]  ;;  %v2014_v8 = vld [vmem:[%s341_s26] sm:$0xff]  ;;  %v1457_v9 = vld [vmem:[%s2137_s2] ss:$0 sm:$0xff]  ;;  %s1804_s24 = smov 88   ;;  %vm498_vm2 = vcmask 64512  }
  0x56   : > { %v1570_v7 = vpack.c.bf16 %v412_v6, %v411_v4  ;;  %p394_p7 = scmp.lt.s32.totalorder %s1785_s30, 1  ;;  %s1805_s12 = smov 72   ;;  %vm1194_vm3 = vcmask 130048   ;;  %vm1196_vm4 = vcmask 195584  }
  0x57   : > { %1568 = vmatpush3.bf16.msra.mxu0 %v1567_v5  ;;  %s1806_s14 = smov 120   ;;  %s1807_s16 = smov 80  }
  0x58   : > { %1569 = vmatprep.subr.bf16.mxu0 %v1799_v0  ;;  %s2164_s30 = smov (!%p394_p7, %s1785_s30), 1  ;;  %s1808_s11 = smov 112  }
  0x59   : > { %s396_s13 = scalar_lea.vmem %s2138_s3, %s2164_s30  ;;  %s1809_s15 = smov 104  }
  0x5a   : > { %v2044_v16 = vld [vmem:[%s396_s13] ss:$0 sm:$0xff]  ;;  %s1810_s19 = smov 56   ;;  %s1811_s22 = smov 40  }
  0x5b   : > { %1571 = vmatpush3.bf16.msra.mxu0 %v1570_v7  ;;  %s1812_s27 = smov 48   ;;  %s1813_s21 = smov 8  }
  0x5c   : > { %1535 = vmatprep.subr.mxu0 %v1801_v1 }
  0x5e   : > { %1513 = vmatmul.mubr.msk.f32.vlgmr.msra.gmra.mrb[0].mxu0 %vm406_vm0, %v2014_v8 }
  0x5f   : > { %1537 = vmatprep.mubr.msk.f32.mxu0 %vm1800_vm1, %v1801_v1 }
 0x131   : > { %v490_v10 = vpop.f32.mrb[0].mxu0 }
 0x132   : > { %v2024_v11 = vadd.f32 %v1457_v9, %v490_v10  ;;  %v1514_v12 = vpop.f32.mrb[1].mxu0 }
 0x134   : > { %595 = vrot.lane.b32.xlu1 %v2024_v11, %s1802_s23  ;;  %496 = vrot.lane.b32.xlu0 %v2024_v11, %s1803_s20  ;;  %s1814_s23 = smov 16   ;;  %s1815_s20 = smov 24  }
 0x138   : > { %673 = vrot.lane.b32.xlu1 %v2024_v11, %s1804_s24 }
 0x1a6   : > { %v497_v13 = vpop.permute.xlu0 %496  ;;  %v596_v14 = vpop.permute.xlu1 %595 }
 0x1a7   : > { %1516 = vmatpush3.xpose.msk.msra.mxu1 %vm498_vm2, %v497_v13 }
 0x1a8   : > { %1520 = vmatprep.subr.mxu1 %v1801_v1 }
 0x1aa   : > { %1518 = vmatmul.mubr.msk.f32.vlgmr.msra.gmra.mrb[0].mxu1 %vm498_vm2, %v2024_v11  ;;  %v674_v26 = vpop.permute.xlu1 %673 }
 0x1ab   : > { %1521 = vmatpush3.msra.mxu1 %v596_v14  ;;  %1522 = vmatprep.mubr.msk.f32.mxu1 %vm1800_vm1, %v1801_v1 }
 0x1ac   : > { %1525 = vmatprep.subr.mxu1 %v1801_v1 }
 0x27d   : > { %v569_v15 = vpop.f32.mrb[0].mxu1 }
 0x27e   : > { %v573_v17 = vmul.f32 0.35355338, %v569_v15  ;;  %v1519_v18 = vpop.f32.mrb[1].mxu1 }
 0x280   : > { %v580_v19 = vadd.f32 %v2044_v16, %v573_v17 }
 0x282   : > { %v581_v20 = vsel %vm498_vm2, %v580_v19, -inf }
 0x283   : > { %582 = vmax.xlane.f32.xlu0 %v581_v20 }
 0x299   : > { %1013 = vrot.lane.b32.xlu0 %v2024_v11, %s1805_s12  ;;  %s1456_s12 = sshll.u32 %s2164_s30, 3 }
 0x310   : > { %v583_v21 = vpop.xlane.xlu0 %582 }
 0x311   : > { %v584_v22 = vsub.f32 %v580_v19, %v583_v21 }
 0x313   : > { %v585_v23 = vmul.f32 1.442695, %v584_v22 }
 0x314   : > { %v1014_v33 = vpop.permute.xlu0 %1013 }
 0x315   : > { %1663 = vpow2.f32 %v585_v23 }
 0x31f   : > { %v1664_v24 = vpop.eup %1663 }
 0x320   : > { %v587_v25 = vsel %vm498_vm2, %v1664_v24, 0.0 }
 0x321   : > { %588 = vadd.xlane.f32.xlu1 %v587_v25 }
 0x332   : > { %671 = vrot.lane.b32.xlu1 %v2024_v11, %s1806_s14 }
 0x336   : > { %843 = vrot.lane.b32.xlu1 %v2024_v11, %s1807_s16 }
 0x33a   : > { %841 = vrot.lane.b32.xlu1 %v2024_v11, %s1808_s11 }
 0x33e   : > { %1011 = vrot.lane.b32.xlu1 %v2024_v11, %s1809_s15 }
 0x3ae   : > { %v589_v27 = vpop.xlane.xlu1 %588 }
 0x3af   : > { %1665 = vrcp.f32 %v589_v27 }
 0x3b2   : > { %v672_v28 = vpop.permute.xlu1 %671 }
 0x3b6   : > { %v844_v29 = vpop.permute.xlu1 %843 }
 0x3b7   : > { %1536 = vmatpush3.xpose.msk.msra.mxu0 %vm498_vm2, %v844_v29 }
 0x3b8   : > { %1545 = vmatprep.subr.mxu0 %v1801_v1 }
 0x3b9   : > { %v1666_v30 = vpop.eup %1665 }
 0x3ba   : > { %v591_v31 = vmul.f32 %v1666_v30, %v589_v27  ;;  %v842_v32 = vpop.permute.xlu1 %841 }
 0x3bb   : > { %1538 = vmatmul.mubr.msk.f32.vlgmr.msra.gmra.mrb[2].mxu0 %vm498_vm2, %v842_v32 }
 0x3bc   : > { %v592_v34 = vsub.f32 2.0, %v591_v31  ;;  %1546 = vmatpush3.xpose.msk.msra.mxu0 %vm498_vm2, %v1014_v33  ;;  %1547 = vmatprep.mubr.msk.f32.mxu0 %vm1800_vm1, %v1801_v1  ;;  %v1200_v31 = vld [vmem:[#allocation5 + $0x8] sm:$0xff]  ;;  %v1201_v33 = vld [vmem:[#allocation5 + $0x10] sm:$0xff] }
 0x3bd   : > { %1572 = vmatprep.subr.bf16.mxu0 %v1799_v0 }
 0x3be   : > { %v593_v35 = vmul.f32 %v1666_v30, %v592_v34  ;;  %v1012_v36 = vpop.permute.xlu1 %1011  ;;  %v1199_v30 = vld [vmem:[#allocation5] sm:$0xff]  ;;  %v1202_v34 = vld [vmem:[#allocation5 + $0x18] sm:$0xff] }
 0x3bf   : > { %1548 = vmatmul.mubr.msk.f32.vlgmr.msra.gmra.mrb[4].mxu0 %vm498_vm2, %v1012_v36  ;;  %v1573_v32 = vpack.c.bf16 %v1200_v31, %v1199_v30 }
 0x3c0   : > { %v594_v37 = vmul.f32 %v1664_v24, %v593_v35  ;;  %1563 = vmatprep.mubr.msk.f32.mxu0 %vm1800_vm1, %v1801_v1  ;;  %v1576_v35 = vpack.c.bf16 %v1202_v34, %v1201_v33 }
 0x3c1   : > { %1574 = vmatpush3.bf16.msra.mxu0 %v1573_v32 }
 0x3c2   : > { %1523 = vmatmul.mubr.msk.f32.vlgmr.msra.gmra.mrb[2].mxu1 %vm498_vm2, %v594_v37  ;;  %1575 = vmatprep.subr.bf16.mxu0 %v1799_v0 }
 0x3c3   : > { %1526 = vmatpush3.xpose.msk.msra.mxu1 %vm498_vm2, %v674_v26  ;;  %1527 = vmatprep.mubr.msk.f32.mxu1 %vm1800_vm1, %v1801_v1 }
 0x3c4   : > { %1530 = vmatprep.subr.mxu1 %v1801_v1 }
 0x3c5   : > { %1577 = vmatpush3.bf16.msra.mxu0 %v1576_v35 }
 0x3c6   : > { %1528 = vmatmul.mubr.msk.f32.vlgmr.msra.gmra.mrb[4].mxu1 %vm498_vm2, %v672_v28 }
 0x3c7   : > { %1532 = vmatprep.mubr.msk.f32.mxu1 %vm1800_vm1, %v1801_v1 }
 0x48e   : > { %v915_v38 = vpop.f32.mrb[2].mxu0 }
 0x48f   : > { %v919_v39 = vmul.f32 0.35355338, %v915_v38  ;;  %v1539_v40 = vpop.f32.mrb[3].mxu0 }
 0x491   : > { %v920_v41 = vadd.f32 %v2044_v16, %v919_v39 }
 0x492   : > { %v1085_v42 = vpop.f32.mrb[4].mxu0 }
 0x493   : > { %v1549_v43 = vpop.f32.mrb[5].mxu0  ;;  %v921_v44 = vsel %vm498_vm2, %v920_v41, -inf  ;;  %v1089_v48 = vmul.f32 0.35355338, %v1085_v42 }
 0x494   : > { %922 = vmax.xlane.f32.xlu0 %v921_v44 }
 0x495   : > { %v2074_v45 = vpop.f32.mrb[2].mxu1  ;;  %v1090_v53 = vadd.f32 %v2044_v16, %v1089_v48 }
 0x496   : > { %v1524_v46 = vpop.f32.mrb[3].mxu1 }
 0x497   : > { %v1091_v54 = vsel %vm498_vm2, %v1090_v53, -inf }
 0x499   : > { %v745_v47 = vpop.f32.mrb[4].mxu1 }
 0x49a   : > { %v749_v49 = vmul.f32 0.35355338, %v745_v47  ;;  %v1529_v50 = vpop.f32.mrb[5].mxu1  ;;  %v1198_v47 = vld [vmem:[#allocation2] sm:$0xff] }
 0x49c   : > { %v750_v51 = vadd.f32 %v2044_v16, %v749_v49 }
 0x49e   : > { %v751_v52 = vsel %vm498_vm2, %v750_v51, -inf }
 0x49f   : > { %752 = vmax.xlane.f32.xlu1 %v751_v52 }
 0x4a3   : > { %1092 = vmax.xlane.f32.xlu1 %v1091_v54 }
 0x521   : > { %v923_v55 = vpop.xlane.xlu0 %922 }
 0x522   : > { %v924_v56 = vsub.f32 %v920_v41, %v923_v55 }
 0x524   : > { %v925_v57 = vmul.f32 1.442695, %v924_v56 }
 0x526   : > { %1667 = vpow2.f32 %v925_v57 }
 0x52c   : > { %v753_v58 = vpop.xlane.xlu1 %752 }
 0x52d   : > { %v754_v59 = vsub.f32 %v750_v51, %v753_v58  ;;  %v1473_v51 = vld [vmem:[%s2140_s5] ss:$0 sm:$0xff] }
 0x52f   : > { %v755_v60 = vmul.f32 1.442695, %v754_v59 }
 0x530   : > { %v1668_v61 = vpop.eup %1667  ;;  %v1093_v62 = vpop.xlane.xlu1 %1092 }
 0x531   : > { %1669 = vpow2.f32 %v755_v60  ;;  %v1094_v63 = vsub.f32 %v1090_v53, %v1093_v62  ;;  %v927_v2 = vsel %vm498_vm2, %v1668_v61, 0.0 }
 0x532   : > { %928 = vadd.xlane.f32.xlu1 %v927_v2  ;;  %v1474_v2 = vld [vmem:[%s2141_s6] ss:$0 sm:$0xff] }
 0x533   : > { %v1095_v3 = vmul.f32 1.442695, %v1094_v63 }
 0x535   : > { %1671 = vpow2.f32 %v1095_v3  ;;  %v1475_v3 = vld [vmem:[%s2142_s7] ss:$0 sm:$0xff] }
 0x53b   : > { %v1670_v4 = vpop.eup %1669 }
 0x53c   : > { %v757_v5 = vsel %vm498_vm2, %v1670_v4, 0.0 }
 0x53d   : > { %758 = vadd.xlane.f32.xlu1 %v757_v5 }
 0x53f   : > { %v1672_v6 = vpop.eup %1671 }
 0x540   : > { %v1097_v7 = vsel %vm498_vm2, %v1672_v6, 0.0 }
 0x541   : > { %1098 = vadd.xlane.f32.xlu0 %v1097_v7 }
 0x54e   : > { %765 = vrot.lane.b32.xlu1 %v2024_v11, %s1810_s19  ;;  %s401_s19 = scalar_lea.vmem %s2143_s8, %s1456_s12 }
 0x552   : > { %1105 = vrot.lane.b32.xlu1 %v2024_v11, %s1811_s22 }
 0x557   : > { %935 = vrot.lane.b32.xlu0 %v2024_v11, %s1812_s27 }
 0x5bf   : > { %v929_v9 = vpop.xlane.xlu1 %928 }
 0x5c0   : > { %1673 = vrcp.f32 %v929_v9 }
 0x5ca   : > { %v759_v10 = vpop.xlane.xlu1 %758  ;;  %v1674_v14 = vpop.eup %1673 }
 0x5cb   : > { %1675 = vrcp.f32 %v759_v10  ;;  %v931_v15 = vmul.f32 %v1674_v14, %v929_v9 }
 0x5cd   : > { %v932_v18 = vsub.f32 2.0, %v931_v15 }
 0x5ce   : > { %v1099_v12 = vpop.xlane.xlu0 %1098  ;;  %v766_v13 = vpop.permute.xlu1 %765 }
 0x5cf   : > { %1677 = vrcp.f32 %v1099_v12  ;;  %1531 = vmatpush3.msra.mxu1 %v766_v13  ;;  %v933_v11 = vmul.f32 %v1674_v14, %v932_v18 }
 0x5d0   : > { %1540 = vmatprep.subr.mxu1 %v1801_v1 }
 0x5d1   : > { %v934_v26 = vmul.f32 %v1668_v61, %v933_v11 }
 0x5d2   : > { %v936_v25 = vpop.permute.xlu0 %935  ;;  %v1106_v28 = vpop.permute.xlu1 %1105 }
 0x5d5   : > { %v1676_v16 = vpop.eup %1675 }
 0x5d6   : > { %v761_v17 = vmul.f32 %v1676_v16, %v759_v10 }
 0x5d8   : > { %v762_v19 = vsub.f32 2.0, %v761_v17 }
 0x5d9   : > { %v1678_v20 = vpop.eup %1677 }
 0x5da   : > { %v763_v21 = vmul.f32 %v1676_v16, %v762_v19  ;;  %v1101_v22 = vmul.f32 %v1678_v20, %v1099_v12 }
 0x5dc   : > { %v764_v23 = vmul.f32 %v1670_v4, %v763_v21  ;;  %v1102_v24 = vsub.f32 2.0, %v1101_v22 }
 0x5de   : > { %1533 = vmatmul.mubr.msk.f32.vlgmr.msra.gmra.mrb[6].mxu1 %vm498_vm2, %v764_v23  ;;  %v1103_v27 = vmul.f32 %v1678_v20, %v1102_v24 }
 0x5df   : > { %1541 = vmatpush3.msra.mxu1 %v936_v25  ;;  %1542 = vmatprep.mubr.msk.f32.mxu1 %vm1800_vm1, %v1801_v1 }
 0x5e0   : > { %1550 = vmatprep.subr.mxu1 %v1801_v1  ;;  %v1104_v29 = vmul.f32 %v1672_v6, %v1103_v27 }
 0x5e2   : > { %1543 = vmatmul.mubr.msk.f32.vlgmr.msra.gmra.mrb[8].mxu1 %vm498_vm2, %v934_v26 }
 0x5e3   : > { %1551 = vmatpush3.msra.mxu1 %v1106_v28  ;;  %1552 = vmatprep.mubr.msk.f32.mxu1 %vm1800_vm1, %v1801_v1 }
 0x5e6   : > { %1553 = vmatmul.mubr.msk.f32.vlgmr.msra.gmra.mrb[10].mxu1 %vm498_vm2, %v1104_v29 }
 0x6b1   : > { %v837_v36 = vpop.f32.mrb[6].mxu1 }
 0x6b2   : > { %1182 = vrot.lane.b32.xlu1 %v837_v36, %s1813_s21  ;;  %v1534_v37 = vpop.f32.mrb[7].mxu1 }
 0x6b5   : > { %v1007_v38 = vpop.f32.mrb[8].mxu1 }
 0x6b6   : > { %1186 = vrot.lane.b32.xlu0 %v1007_v38, %s1814_s23  ;;  %v1544_v1 = vpop.f32.mrb[9].mxu1 }
 0x6b9   : > { %v1177_v39 = vpop.f32.mrb[10].mxu1 }
 0x6ba   : > { %1190 = vrot.lane.b32.xlu1 %v1177_v39, %s1815_s20  ;;  %v1554_v40 = vpop.f32.mrb[11].mxu1 }
 0x724   : > { %v1183_v41 = vpop.permute.xlu1 %1182 }
 0x725   : > { %v1193_v0 = vsel %vm498_vm2, %v2074_v45, %v1183_v41 }
 0x728   : > { %v1187_v42 = vpop.permute.xlu0 %1186 }
 0x729   : > { %v1195_v43 = vsel %vm1194_vm3, %v1193_v0, %v1187_v42 }
 0x72c   : > { %v1191_v44 = vpop.permute.xlu1 %1190 }
 0x72d   : > { %v1197_v46 = vsel %vm1196_vm4, %v1195_v43, %v1191_v44 }
 0x72e   : > { %1564 = vmatmul.mubr.msk.f32.vlgmr.msra.gmra.mrb[6].mxu0 %vm406_vm0, %v1197_v46 }
 0x801   : > { %v1272_v48 = vpop.f32.mrb[6].mxu0 }
 0x802   : > { %v1276_v49 = vadd.f32 %v1272_v48, %v1198_v47  ;;  %v1565_v50 = vpop.f32.mrb[7].mxu0 }
 0x804   : > { %1277 = vst.msk [vmem:[#allocation2] sm:$0xff] %vm406_vm0, %v1276_v49 }
 0x80b   : > { %v1281_v52 = vld [vmem:[#allocation2] sm:$0xff] }
 0x80c   : > { %v1289_v53 = vadd.f32 %v1473_v51, %v1281_v52 }
 0x80e   : > { %v1291_v45 = vadd.f32 %v1289_v53, %v2014_v8 }
 0x810   : > { %v1292_v54 = vsel %vm406_vm0, %v1291_v45, 0.0 }
 0x811   : > { %1293 = vadd.xlane.f32.xlu0 %v1292_v54 }
 0x89e   : > { %v1294_v55 = vpop.xlane.xlu0 %1293 }
 0x89f   : > { %v1296_v56 = vmul.f32 0.03125, %v1294_v55 }
 0x8a1   : > { %v1297_v57 = vsub.f32 %v1291_v45, %v1296_v56 }
 0x8a3   : > { %v1298_v58 = vmul.f32 %v1297_v57, %v1297_v57 }
 0x8a5   : > { %v1299_v59 = vsel %vm406_vm0, %v1298_v58, 0.0 }
 0x8a6   : > { %1300 = vadd.xlane.f32.xlu1 %v1299_v59 }
 0x933   : > { %v1301_v60 = vpop.xlane.xlu1 %1300 }
 0x934   : > { %v1302_v61 = vmul.f32 0.03125, %v1301_v60 }
 0x936   : > { %v1303_v62 = vadd.f32 1e-12, %v1302_v61 }
 0x938   : > { %1679 = vrsqrt.f32 %v1303_v62 }
 0x942   : > { %v1680_v63 = vpop.eup %1679 }
 0x943   : > { %v1305_v8 = vmul.f32 %v1680_v63, %v1297_v57 }
 0x945   : > { %v1313_v4 = vmul.f32 %v1474_v2, %v1305_v8 }
 0x947   : > { %v1321_v5 = vadd.f32 %v1475_v3, %v1313_v4 }
 0x949   : > { %1322 = vst.msk [vmem:[%s401_s19] sm:$0xff] %vm406_vm0, %v1321_v5 }
 0x94a PF: > { %s22_s10 = sadd.s32 1, %s1793_s10   ;;  %s2156_s27 = smov %s1777_s28 }
 0x94b   : > { %p19_p1 = scmp.ge.s32.totalorder %s22_s10, 4   ;;  %s2157_s28 = smov %s1781_s29 }
 0x94c   : > { %s2158_s29 = smov %s1944_s25  ;;  %s2159_s30 = smov %s1789_s9 }
 0x94d   : > { %s2160_s9 = smov %s2162_s18  ;;  %21 = sbr.rel (!%p19_p1) target bundleno = 5 (0x5), region = 114 }
 0x954   :  { %1342 = vsyncpa [#allocation4], 1 }
 0x955   :  { %1344 = vsyncpa [#allocation4 + $0x1], 1 }
 0x956   :  { %1345 = vsyncpa [#allocation6], 1 }

// kernel: bert_encoder_forward.6
= control target key start
LH: loop header
LB: loop body
LE: loop exit
PB: predicated region body
PF: predicated region fallthrough
CT: control target
= control target key end

     0   :  { %s1690_s27 = smov 0   ;;  %s1692_s28 = smov 0   ;;  %s1858_s0 = inlined_call_operand.vmem [shape: f32[2,8,32], index: 0, kind: input, shape index: {}]   ;;  %s1859_s1 = inlined_call_operand.vmem [shape: f32[32,96], index: 1, kind: input, shape index: {}]   ;;  %s1860_s2 = inlined_call_operand.vmem [shape: f32[1,96], index: 2, kind: input, shape index: {}]   ;;  %s1861_s3 = inlined_call_operand.vmem [shape: f32[2,1,8], index: 3, kind: input, shape index: {}]   ;;  %s1862_s4 = inlined_call_operand.vmem [shape: f32[32,32], index: 4, kind: input, shape index: {}]   ;;  %s1863_s5 = inlined_call_operand.vmem [shape: f32[1,32], index: 5, kind: input, shape index: {}]   ;;  %s1864_s6 = inlined_call_operand.vmem [shape: f32[1,32], index: 6, kind: input, shape index: {}]   ;;  %s1865_s7 = inlined_call_operand.vmem [shape: f32[1,32], index: 7, kind: input, shape index: {}]   ;;  %s1866_s8 = inlined_call_operand.vmem [shape: f32[2,8,32], index: 8, kind: output, shape index: {}]  }
   0x1   :  { %s1694_s29 = smov 0  }
   0x2 LB: > { %s30_s30 = sadd.s32 1, %s1622_s28  ;;  %p1421_p0 = scmp.ge.s32.totalorder %s1626_s29, 1  ;;  %s1626_s29 = sphi %s1694_s29, %s18_s29   ;;  %s1622_s28 = sphi %s1692_s28, %s1868_s28   ;;  %s1618_s27 = sphi %s1690_s27, %s1867_s27  }
   0x3   : > { %p32_p1 = scmp.ge.s32.totalorder %s30_s30, 2  ;;  %p309_p2 = scmp.lt.s32.totalorder %s1626_s29, 3 }
   0x5   : > { %s1870_s30 = smov (%p32_p1, %s30_s30), 0  ;;  %p310_p3 = pnand %p1421_p0, %p309_p2 }
   0x6   : > { %v387_v0 = vld [vmem:[%s1859_s1] sm:$0xff] (!%p310_p3)  ;;  %v388_v1 = vld [vmem:[%s1859_s1 + $0x8] sm:$0xff] (!%p310_p3)  ;;  %v389_v2 = vld [vmem:[%s1859_s1 + $0x10] sm:$0xff] (!%p310_p3)  ;;  %v1628_v3 = vmov (!%p310_p3), 0.0|0.0   ;;  %vm1629_vm0 = vmmov (!%p310_p3), 0   ;;  %v1630_v6 = vmov (!%p310_p3), 0.0  }
   0x7   : > { %313 = sbr.rel (%p310_p3) target bundleno = 2302 (0x8fe), region = 52  ;;  %1533 = vmatprep.subr.bf16.mxu0 (!%p310_p3), %v1628_v3  ;;  %v1534_v4 = vpack.c.bf16 (!%p310_p3), %v388_v1, %v387_v0  ;;  %v390_v5 = vld [vmem:[%s1859_s1 + $0x18] sm:$0xff] (!%p310_p3)  ;;  %1479 = vmatprep.mubr.msk.f32.mxu0 (!%p310_p3), %vm1629_vm0, %v1630_v6  ;;  %p356_p4 = scmp.lt.s32.totalorder (!%p310_p3), %s1618_s27, 1  ;;  %vm384_vm1 = vcmask (!%p310_p3), 261120   ;;  %v1424_v9 = vld [vmem:[%s1860_s2] ss:$0 sm:$0xff] (!%p310_p3) }
   0x8   : > { %385 = vst.msk [vmem:[#allocation2] sm:$0xff] (!%p310_p3), %vm384_vm1, %v1630_v6  ;;  %1482 = vmatprep.subr.mxu1 (!%p310_p3), %v1630_v6  ;;  %1484 = vmatprep.mubr.msk.f32.mxu1 (!%p310_p3), %vm1629_vm0, %v1630_v6  ;;  %v1537_v7 = vpack.c.bf16 (!%p310_p3), %v390_v5, %v389_v2  ;;  %s1631_s23 = smov (!%p310_p3), 64   ;;  %s1632_s24 = smov (!%p310_p3), 96   ;;  %vm476_vm2 = vcmask (!%p310_p3), 64512   ;;  %vm1172_vm3 = vcmask (!%p310_p3), 130048   ;;  %vm1174_vm4 = vcmask (!%p310_p3), 195584  }
   0x9   : > { %1535 = vmatpush3.bf16.msra.mxu0 (!%p310_p3), %v1534_v4  ;;  %s1633_s25 = smov (!%p310_p3), 88   ;;  %s1634_s11 = smov (!%p310_p3), 72  }
   0xa   : > { %1536 = vmatprep.subr.bf16.mxu0 (!%p310_p3), %v1628_v3  ;;  %s1635_s12 = smov (!%p310_p3), 120   ;;  %s1636_s13 = smov (!%p310_p3), 80  }
   0xb   : > { %s1637_s14 = smov (!%p310_p3), 112   ;;  %s1638_s15 = smov (!%p310_p3), 104  }
   0xc   : > { %s1639_s16 = smov (!%p310_p3), 56   ;;  %s1640_s18 = smov (!%p310_p3), 40  }
   0xd   : > { %1538 = vmatpush3.bf16.msra.mxu0 (!%p310_p3), %v1537_v7  ;;  %s1641_s19 = smov (!%p310_p3), 48  }
   0xe   : > { %s1872_s27 = smov (!%p356_p4, %s1618_s27), 1  ;;  %1502 = vmatprep.subr.mxu0 %v1630_v6 }
   0xf   : > { %s1422_s17 = sshll.u32 %s1872_s27, 3  ;;  %s369_s10 = scalar_lea.vmem %s1861_s3, %s1872_s27 }
  0x10   : > { %s359_s20 = scalar_lea.vmem %s1858_s0, %s1422_s17  ;;  %v1763_v16 = vld [vmem:[%s369_s10] ss:$0 sm:$0xff]  ;;  %s1642_s10 = smov 8  }
  0x11   : > { %v1737_v8 = vld [vmem:[%s359_s20] sm:$0xff]  ;;  %s379_s22 = scalar_lea.vmem %s1866_s8, %s1422_s17 }
  0x12   : > { %1480 = vmatmul.mubr.msk.f32.vlgmr.msra.gmra.mrb[0].mxu0 %vm384_vm1, %v1737_v8 }
  0x13   : > { %1504 = vmatprep.mubr.msk.f32.mxu0 %vm1629_vm0, %v1630_v6 }
  0xe5   : > { %v468_v10 = vpop.f32.mrb[0].mxu0 }
  0xe6   : > { %v1747_v11 = vadd.f32 %v1424_v9, %v468_v10  ;;  %v1481_v12 = vpop.f32.mrb[1].mxu0 }
  0xe8   : > { %573 = vrot.lane.b32.xlu1 %v1747_v11, %s1631_s23  ;;  %474 = vrot.lane.b32.xlu0 %v1747_v11, %s1632_s24 }
  0xec   : > { %651 = vrot.lane.b32.xlu1 %v1747_v11, %s1633_s25 }
 0x15a   : > { %v475_v13 = vpop.permute.xlu0 %474  ;;  %v574_v14 = vpop.permute.xlu1 %573 }
 0x15b   : > { %1483 = vmatpush3.xpose.msk.msra.mxu1 %vm476_vm2, %v475_v13 }
 0x15c   : > { %1487 = vmatprep.subr.mxu1 %v1630_v6 }
 0x15e   : > { %1485 = vmatmul.mubr.msk.f32.vlgmr.msra.gmra.mrb[0].mxu1 %vm476_vm2, %v1747_v11  ;;  %v652_v26 = vpop.permute.xlu1 %651 }
 0x15f   : > { %1488 = vmatpush3.msra.mxu1 %v574_v14  ;;  %1489 = vmatprep.mubr.msk.f32.mxu1 %vm1629_vm0, %v1630_v6 }
 0x160   : > { %1492 = vmatprep.subr.mxu1 %v1630_v6 }
 0x231   : > { %v547_v15 = vpop.f32.mrb[0].mxu1 }
 0x232   : > { %v551_v17 = vmul.f32 0.35355338, %v547_v15  ;;  %v1486_v18 = vpop.f32.mrb[1].mxu1 }
 0x234   : > { %v558_v19 = vadd.f32 %v1763_v16, %v551_v17 }
 0x236   : > { %v559_v20 = vsel %vm476_vm2, %v558_v19, -inf }
 0x237   : > { %560 = vmax.xlane.f32.xlu0 %v559_v20 }
 0x24d   : > { %991 = vrot.lane.b32.xlu0 %v1747_v11, %s1634_s11  ;;  %s1643_s11 = smov 16  }
 0x2c4   : > { %v561_v21 = vpop.xlane.xlu0 %560 }
 0x2c5   : > { %v562_v22 = vsub.f32 %v558_v19, %v561_v21 }
 0x2c7   : > { %v563_v23 = vmul.f32 1.442695, %v562_v22 }
 0x2c8   : > { %v992_v33 = vpop.permute.xlu0 %991 }
 0x2c9   : > { %1586 = vpow2.f32 %v563_v23 }
 0x2d3   : > { %v1587_v24 = vpop.eup %1586 }
 0x2d4   : > { %v565_v25 = vsel %vm476_vm2, %v1587_v24, 0.0 }
 0x2d5   : > { %566 = vadd.xlane.f32.xlu1 %v565_v25 }
 0x2e6   : > { %649 = vrot.lane.b32.xlu1 %v1747_v11, %s1635_s12  ;;  %s1644_s12 = smov 24  }
 0x2ea   : > { %821 = vrot.lane.b32.xlu1 %v1747_v11, %s1636_s13 }
 0x2ee   : > { %819 = vrot.lane.b32.xlu1 %v1747_v11, %s1637_s14 }
 0x2f2   : > { %989 = vrot.lane.b32.xlu1 %v1747_v11, %s1638_s15 }
 0x362   : > { %v567_v27 = vpop.xlane.xlu1 %566 }
 0x363   : > { %1588 = vrcp.f32 %v567_v27 }
 0x366   : > { %v650_v28 = vpop.permute.xlu1 %649 }
 0x36a   : > { %v822_v29 = vpop.permute.xlu1 %821 }
 0x36b   : > { %1503 = vmatpush3.xpose.msk.msra.mxu0 %vm476_vm2, %v822_v29 }
 0x36c   : > { %1512 = vmatprep.subr.mxu0 %v1630_v6 }
 0x36d   : > { %v1589_v30 = vpop.eup %1588 }
 0x36e   : > { %v569_v31 = vmul.f32 %v1589_v30, %v567_v27  ;;  %v820_v32 = vpop.permute.xlu1 %819 }
 0x36f   : > { %1505 = vmatmul.mubr.msk.f32.vlgmr.msra.gmra.mrb[2].mxu0 %vm476_vm2, %v820_v32 }
 0x370   : > { %v570_v34 = vsub.f32 2.0, %v569_v31  ;;  %1513 = vmatpush3.xpose.msk.msra.mxu0 %vm476_vm2, %v992_v33  ;;  %1514 = vmatprep.mubr.msk.f32.mxu0 %vm1629_vm0, %v1630_v6  ;;  %v1178_v31 = vld [vmem:[%s1862_s4 + $0x8] sm:$0xff]  ;;  %v1179_v33 = vld [vmem:[%s1862_s4 + $0x10] sm:$0xff] }
 0x371   : > { %1539 = vmatprep.subr.bf16.mxu0 %v1628_v3 }
 0x372   : > { %v571_v35 = vmul.f32 %v1589_v30, %v570_v34  ;;  %v990_v36 = vpop.permute.xlu1 %989  ;;  %v1177_v30 = vld [vmem:[%s1862_s4] sm:$0xff] }
 0x373   : > { %1515 = vmatmul.mubr.msk.f32.vlgmr.msra.gmra.mrb[4].mxu0 %vm476_vm2, %v990_v36  ;;  %v1540_v32 = vpack.c.bf16 %v1178_v31, %v1177_v30 }
 0x374   : > { %v572_v37 = vmul.f32 %v1587_v24, %v571_v35  ;;  %1530 = vmatprep.mubr.msk.f32.mxu0 %vm1629_vm0, %v1630_v6 }
 0x375   : > { %1541 = vmatpush3.bf16.msra.mxu0 %v1540_v32 }
 0x376   : > { %1490 = vmatmul.mubr.msk.f32.vlgmr.msra.gmra.mrb[2].mxu1 %vm476_vm2, %v572_v37  ;;  %1542 = vmatprep.subr.bf16.mxu0 %v1628_v3 }
 0x377   : > { %1493 = vmatpush3.xpose.msk.msra.mxu1 %vm476_vm2, %v652_v26  ;;  %1494 = vmatprep.mubr.msk.f32.mxu1 %vm1629_vm0, %v1630_v6 }
 0x378   : > { %1497 = vmatprep.subr.mxu1 %v1630_v6 }
 0x37a   : > { %1495 = vmatmul.mubr.msk.f32.vlgmr.msra.gmra.mrb[4].mxu1 %vm476_vm2, %v650_v28 }
 0x37b   : > { %1499 = vmatprep.mubr.msk.f32.mxu1 %vm1629_vm0, %v1630_v6 }
 0x442   : > { %v893_v38 = vpop.f32.mrb[2].mxu0 }
 0x443   : > { %v897_v39 = vmul.f32 0.35355338, %v893_v38  ;;  %v1506_v40 = vpop.f32.mrb[3].mxu0 }
 0x445   : > { %v898_v41 = vadd.f32 %v1763_v16, %v897_v39 }
 0x446   : > { %v1063_v42 = vpop.f32.mrb[4].mxu0 }
 0x447   : > { %v1516_v43 = vpop.f32.mrb[5].mxu0  ;;  %v899_v44 = vsel %vm476_vm2, %v898_v41, -inf  ;;  %v1067_v48 = vmul.f32 0.35355338, %v1063_v42 }
 0x448   : > { %900 = vmax.xlane.f32.xlu0 %v899_v44 }
 0x449   : > { %v1793_v45 = vpop.f32.mrb[2].mxu1  ;;  %v1068_v53 = vadd.f32 %v1763_v16, %v1067_v48 }
 0x44a   : > { %v1491_v46 = vpop.f32.mrb[3].mxu1 }
 0x44b   : > { %v1069_v54 = vsel %vm476_vm2, %v1068_v53, -inf }
 0x44d   : > { %v723_v47 = vpop.f32.mrb[4].mxu1 }
 0x44e   : > { %v727_v49 = vmul.f32 0.35355338, %v723_v47  ;;  %v1496_v50 = vpop.f32.mrb[5].mxu1  ;;  %v1176_v47 = vld [vmem:[#allocation2] sm:$0xff] }
 0x450   : > { %v728_v51 = vadd.f32 %v1763_v16, %v727_v49 }
 0x452   : > { %v729_v52 = vsel %vm476_vm2, %v728_v51, -inf }
 0x453   : > { %730 = vmax.xlane.f32.xlu1 %v729_v52 }
 0x457   : > { %1070 = vmax.xlane.f32.xlu1 %v1069_v54 }
 0x4d5   : > { %v901_v55 = vpop.xlane.xlu0 %900 }
 0x4d6   : > { %v902_v56 = vsub.f32 %v898_v41, %v901_v55 }
 0x4d8   : > { %v903_v57 = vmul.f32 1.442695, %v902_v56 }
 0x4da   : > { %1590 = vpow2.f32 %v903_v57 }
 0x4e0   : > { %v731_v58 = vpop.xlane.xlu1 %730 }
 0x4e1   : > { %v732_v59 = vsub.f32 %v728_v51, %v731_v58  ;;  %v1440_v51 = vld [vmem:[%s1863_s5] ss:$0 sm:$0xff] }
 0x4e3   : > { %v733_v60 = vmul.f32 1.442695, %v732_v59 }
 0x4e4   : > { %v1591_v61 = vpop.eup %1590  ;;  %v1071_v62 = vpop.xlane.xlu1 %1070 }
 0x4e5   : > { %1592 = vpow2.f32 %v733_v60  ;;  %v1072_v63 = vsub.f32 %v1068_v53, %v1071_v62  ;;  %v905_v0 = vsel %vm476_vm2, %v1591_v61, 0.0 }
 0x4e6   : > { %906 = vadd.xlane.f32.xlu1 %v905_v0 }
 0x4e7   : > { %v1073_v1 = vmul.f32 1.442695, %v1072_v63 }
 0x4e9   : > { %1594 = vpow2.f32 %v1073_v1  ;;  %v1442_v1 = vld [vmem:[%s1865_s7] ss:$0 sm:$0xff] }
 0x4ef   : > { %v1593_v2 = vpop.eup %1592 }
 0x4f0   : > { %v735_v4 = vsel %vm476_vm2, %v1593_v2, 0.0 }
 0x4f1   : > { %736 = vadd.xlane.f32.xlu1 %v735_v4 }
 0x4f3   : > { %v1595_v5 = vpop.eup %1594 }
 0x4f4   : > { %v1075_v7 = vsel %vm476_vm2, %v1595_v5, 0.0 }
 0x4f5   : > { %1076 = vadd.xlane.f32.xlu0 %v1075_v7 }
 0x502   : > { %743 = vrot.lane.b32.xlu1 %v1747_v11, %s1639_s16 }
 0x506   : > { %1083 = vrot.lane.b32.xlu1 %v1747_v11, %s1640_s18 }
 0x50b   : > { %913 = vrot.lane.b32.xlu0 %v1747_v11, %s1641_s19 }
 0x573   : > { %v907_v9 = vpop.xlane.xlu1 %906 }
 0x574   : > { %1596 = vrcp.f32 %v907_v9 }
 0x57e   : > { %v737_v10 = vpop.xlane.xlu1 %736  ;;  %v1597_v14 = vpop.eup %1596 }
 0x57f   : > { %1598 = vrcp.f32 %v737_v10  ;;  %v909_v15 = vmul.f32 %v1597_v14, %v907_v9 }
 0x581   : > { %v910_v18 = vsub.f32 2.0, %v909_v15 }
 0x582   : > { %v1077_v12 = vpop.xlane.xlu0 %1076  ;;  %v744_v13 = vpop.permute.xlu1 %743 }
 0x583   : > { %1600 = vrcp.f32 %v1077_v12  ;;  %1498 = vmatpush3.msra.mxu1 %v744_v13  ;;  %v911_v11 = vmul.f32 %v1597_v14, %v910_v18 }
 0x584   : > { %1507 = vmatprep.subr.mxu1 %v1630_v6 }
 0x585   : > { %v912_v26 = vmul.f32 %v1591_v61, %v911_v11 }
 0x586   : > { %v914_v25 = vpop.permute.xlu0 %913  ;;  %v1084_v28 = vpop.permute.xlu1 %1083 }
 0x589   : > { %v1599_v16 = vpop.eup %1598 }
 0x58a   : > { %v739_v17 = vmul.f32 %v1599_v16, %v737_v10 }
 0x58c   : > { %v740_v19 = vsub.f32 2.0, %v739_v17 }
 0x58d   : > { %v1601_v20 = vpop.eup %1600 }
 0x58e   : > { %v741_v21 = vmul.f32 %v1599_v16, %v740_v19  ;;  %v1079_v22 = vmul.f32 %v1601_v20, %v1077_v12 }
 0x590   : > { %v742_v23 = vmul.f32 %v1593_v2, %v741_v21  ;;  %v1080_v24 = vsub.f32 2.0, %v1079_v22 }
 0x592   : > { %1500 = vmatmul.mubr.msk.f32.vlgmr.msra.gmra.mrb[6].mxu1 %vm476_vm2, %v742_v23  ;;  %v1081_v27 = vmul.f32 %v1601_v20, %v1080_v24 }
 0x593   : > { %1508 = vmatpush3.msra.mxu1 %v914_v25  ;;  %1509 = vmatprep.mubr.msk.f32.mxu1 %vm1629_vm0, %v1630_v6 }
 0x594   : > { %1517 = vmatprep.subr.mxu1 %v1630_v6  ;;  %v1082_v29 = vmul.f32 %v1595_v5, %v1081_v27 }
 0x596   : > { %1510 = vmatmul.mubr.msk.f32.vlgmr.msra.gmra.mrb[8].mxu1 %vm476_vm2, %v912_v26 }
 0x597   : > { %1518 = vmatpush3.msra.mxu1 %v1084_v28  ;;  %1519 = vmatprep.mubr.msk.f32.mxu1 %vm1629_vm0, %v1630_v6  ;;  %v1180_v6 = vld [vmem:[%s1862_s4 + $0x18] sm:$0xff] }
 0x598   : > { %v1543_v34 = vpack.c.bf16 %v1180_v6, %v1179_v33 }
 0x59a   : > { %1520 = vmatmul.mubr.msk.f32.vlgmr.msra.gmra.mrb[10].mxu1 %vm476_vm2, %v1082_v29  ;;  %1544 = vmatpush3.bf16.msra.mxu0 %v1543_v34 }
 0x665   : > { %v815_v35 = vpop.f32.mrb[6].mxu1 }
 0x666   : > { %1160 = vrot.lane.b32.xlu1 %v815_v35, %s1642_s10  ;;  %v1501_v36 = vpop.f32.mrb[7].mxu1 }
 0x669   : > { %v985_v37 = vpop.f32.mrb[8].mxu1 }
 0x66a   : > { %1164 = vrot.lane.b32.xlu0 %v985_v37, %s1643_s11  ;;  %v1511_v38 = vpop.f32.mrb[9].mxu1 }
 0x66d   : > { %v1155_v39 = vpop.f32.mrb[10].mxu1 }
 0x66e   : > { %1168 = vrot.lane.b32.xlu1 %v1155_v39, %s1644_s12  ;;  %v1521_v3 = vpop.f32.mrb[11].mxu1 }
 0x6d8   : > { %v1161_v40 = vpop.permute.xlu1 %1160 }
 0x6d9   : > { %v1171_v42 = vsel %vm476_vm2, %v1793_v45, %v1161_v40 }
 0x6dc   : > { %v1165_v41 = vpop.permute.xlu0 %1164 }
 0x6dd   : > { %v1173_v43 = vsel %vm1172_vm3, %v1171_v42, %v1165_v41 }
 0x6e0   : > { %v1169_v44 = vpop.permute.xlu1 %1168 }
 0x6e1   : > { %v1175_v46 = vsel %vm1174_vm4, %v1173_v43, %v1169_v44 }
 0x6e2   : > { %1531 = vmatmul.mubr.msk.f32.vlgmr.msra.gmra.mrb[6].mxu0 %vm384_vm1, %v1175_v46 }
 0x7b5   : > { %v1250_v48 = vpop.f32.mrb[6].mxu0 }
 0x7b6   : > { %v1254_v49 = vadd.f32 %v1250_v48, %v1176_v47  ;;  %v1532_v50 = vpop.f32.mrb[7].mxu0 }
 0x7b8   : > { %1255 = vst.msk [vmem:[#allocation2] sm:$0xff] %vm384_vm1, %v1254_v49 }
 0x7bf   : > { %v1259_v52 = vld [vmem:[#allocation2] sm:$0xff] }
 0x7c0   : > { %v1267_v53 = vadd.f32 %v1440_v51, %v1259_v52 }
 0x7c2   : > { %v1269_v54 = vadd.f32 %v1267_v53, %v1737_v8  ;;  %v1441_v8 = vld [vmem:[%s1864_s6] ss:$0 sm:$0xff] }
 0x7c4   : > { %v1270_v45 = vsel %vm384_vm1, %v1269_v54, 0.0 }
 0x7c5   : > { %1271 = vadd.xlane.f32.xlu0 %v1270_v45 }
 0x852   : > { %v1272_v55 = vpop.xlane.xlu0 %1271 }
 0x853   : > { %v1274_v56 = vmul.f32 0.03125, %v1272_v55 }
 0x855   : > { %v1275_v57 = vsub.f32 %v1269_v54, %v1274_v56 }
 0x857   : > { %v1276_v58 = vmul.f32 %v1275_v57, %v1275_v57 }
 0x859   : > { %v1277_v59 = vsel %vm384_vm1, %v1276_v58, 0.0 }
 0x85a   : > { %1278 = vadd.xlane.f32.xlu1 %v1277_v59 }
 0x8e7   : > { %v1279_v60 = vpop.xlane.xlu1 %1278 }
 0x8e8   : > { %v1280_v61 = vmul.f32 0.03125, %v1279_v60 }
 0x8ea   : > { %v1281_v62 = vadd.f32 1e-12, %v1280_v61 }
 0x8ec   : > { %1602 = vrsqrt.f32 %v1281_v62 }
 0x8f6   : > { %v1603_v63 = vpop.eup %1602 }
 0x8f7   : > { %v1283_v0 = vmul.f32 %v1603_v63, %v1275_v57 }
 0x8f9   : > { %v1291_v2 = vmul.f32 %v1441_v8, %v1283_v0 }
 0x8fb   : > { %v1299_v4 = vadd.f32 %v1442_v1, %v1291_v2 }
 0x8fd   : > { %1300 = vst.msk [vmem:[%s379_s22] sm:$0xff] %vm384_vm1, %v1299_v4 }
 0x8fe PF: > { %s18_s29 = sadd.s32 1, %s1626_s29   ;;  %s1867_s27 = smov %s1622_s28 }
 0x8ff   : > { %p15_p5 = scmp.ge.s32.totalorder %s18_s29, 4   ;;  %s1868_s28 = smov %s1870_s30 }
 0x901   :  { %17 = sbr.rel (!%p15_p5) target bundleno = 2 (0x2), region = 102 }

</bundles_post_ra>
